<compile_context>
chip_gen: v7x
topology: tpu7x:2x2x1
jax: 0.10.0
libtpu: 0.0.40
codegen_flags: <defaults>
</compile_context>

<pallas_src>
import math

import jax
import jax.numpy as jnp
from jax import lax
from jax.experimental import pallas as pl
from jax.experimental.pallas import tpu as pltpu

LN_EPS = 1e-5


def _cdiv(a, b):
    return -(-a // b)


def _round_up(a, m):
    return _cdiv(a, m) * m


def conv_layer_forward(x, encoder_padding_mask, gamma, beta, weight, bias,
                       *, time_tile=None, fuse_taps=None):
    """Fused LayerNorm(c_in) + conv_tbc(weight, bias, padding=K//2).

    x: (T, B, Cin); encoder_padding_mask: (B, T) bool (True = padded) or None;
    gamma/beta: (Cin,); weight: (K, Cin, Cout); bias: (Cout,).
    Returns (T_out, B, Cout), T_out = T + 2*(K//2) - (K - 1).
    """
    T, B, Cin = x.shape
    K, Cin_w, Cout = weight.shape
    assert Cin_w == Cin
    pad = K // 2
    T_out = T + 2 * pad - (K - 1)

    # ---- tile choice -----------------------------------------------------
    # Flattened (time, batch) rows per grid step; rows must be a sublane
    # multiple for the input dtype (8 for f32, 16 for bf16).  NOTE: the
    # per-tap row shifts (k*B) are cheapest when B itself is a sublane
    # multiple (pad the batch upstream for odd/small B if it matters).
    itemsize = jnp.dtype(x.dtype).itemsize
    sub = {4: 8, 2: 16, 1: 32}.get(itemsize, 8)
    m = sub // math.gcd(B, sub)
    if time_tile is None:
        time_tile = max(1, 2048 // B)          # ~2048 flattened rows / step
    tT = max(m, _round_up(min(time_tile, _round_up(T_out, m)), m))
    nT = _cdiv(T_out, tT)
    # v7x runs the "parallel" axis on 2 TensorCores: prefer an even step count.
    if nT > 1 and nT % 2 == 1:
        tT_alt = max(m, _round_up(_cdiv(T_out, nT + 1), m))
        if _cdiv(T_out, tT_alt) == nT + 1:
            tT, nT = tT_alt, nT + 1

    rows = tT * B                        # output rows per grid step
    Tw = tT + K - 1                      # input time window per step
    rows_total = Tw * B
    ph = pad * B                         # left-halo rows
    qh = (K - 1 - pad) * B               # right-halo rows
    has_left = ph > 0
    has_right = qh > 0
    has_mask = encoder_padding_mask is not None

    if fuse_taps is None:
        kind = jax.devices()[0].device_kind.lower()
        # v5e (4x 128-deep MXU): K accumulating dots avoid the im2col copy for
        # free; v6e/v7x (256-deep MXU) prefer one fused K*Cin-deep matmul.
        fuse_taps = not ("v5 lite" in kind or "v5e" in kind)

    # ---- operands (no padded copy of x; single HBM read of x) -------------
    x2 = x.reshape(T * B, Cin)                       # free contiguous reshape
    last_main = max(0, (T * B - 1) // rows)          # clamp fully-OOB blocks

    inputs = [x2]
    in_specs = [pl.BlockSpec((rows, Cin),
                             lambda i: (jnp.minimum(i, last_main), 0))]

    if has_left:
        li = (jnp.arange(nT, dtype=jnp.int32)[:, None] * rows - ph
              + jnp.arange(ph, dtype=jnp.int32)[None, :])
        left = x2[jnp.clip(li, 0, T * B - 1)]                 # (nT, ph, Cin)
        inputs.append(left)
        in_specs.append(pl.BlockSpec((None, ph, Cin), lambda i: (i, 0, 0)))
    if has_right:
        ri = ((jnp.arange(nT, dtype=jnp.int32)[:, None] + 1) * rows
              + jnp.arange(qh, dtype=jnp.int32)[None, :])
        right = x2[jnp.clip(ri, 0, T * B - 1)]                # (nT, qh, Cin)
        inputs.append(right)
        in_specs.append(pl.BlockSpec((None, qh, Cin), lambda i: (i, 0, 0)))

    if has_mask:
        # Reduce the (B, T) mask to per-batch [start, end) keep spans and
        # pre-bake them into per-row bounds (constant block -> fetched once).
        # TODO(synk): a non-contiguous padding mask is not representable as a
        # single span; standard leading/trailing encoder padding masks are.
        keep_bt = jnp.logical_not(encoder_padding_mask)        # (B, T)
        any_keep = keep_bt.any(axis=1)
        first = jnp.argmax(keep_bt, axis=1).astype(jnp.int32)
        last = (T - 1 - jnp.argmax(keep_bt[:, ::-1], axis=1)).astype(jnp.int32)
        start = jnp.where(any_keep, first, jnp.int32(0))
        end = jnp.where(any_keep, last + 1, jnp.int32(0))
        b_idx = jnp.arange(rows_total, dtype=jnp.int32) % B
        lo = (start[b_idx] + pad) * B + b_idx      # keep row r iff lo<=r<hi
        hi = (end[b_idx] + pad) * B + b_idx
        bounds = jnp.stack([lo, hi], axis=1).astype(jnp.int32)  # (rows_total,2)
        inputs.append(bounds)
        in_specs.append(pl.BlockSpec((rows_total, 2), lambda i: (0, 0)))

    gamma2 = gamma.reshape(1, Cin).astype(jnp.float32)
    beta2 = beta.reshape(1, Cin).astype(jnp.float32)
    w2 = weight.reshape(K * Cin, Cout).astype(jnp.bfloat16)   # bf16 MXU weights
    bias2 = bias.reshape(1, Cout).astype(jnp.float32)
    inputs += [gamma2, beta2, w2, bias2]
    in_specs += [pl.BlockSpec((1, Cin), lambda i: (0, 0)),
                 pl.BlockSpec((1, Cin), lambda i: (0, 0)),
                 pl.BlockSpec((K * Cin, Cout), lambda i: (0, 0)),
                 pl.BlockSpec((1, Cout), lambda i: (0, 0))]

    out_dtype = x.dtype

    def kernel(*refs):
        it = iter(refs)
        x_ref = next(it)
        l_ref = next(it) if has_left else None
        r_ref = next(it) if has_right else None
        bd_ref = next(it) if has_mask else None
        g_ref = next(it)
        bt_ref = next(it)
        w_ref = next(it)
        bs_ref = next(it)
        o_ref = next(it)

        i = pl.program_id(0)
        # Global padded-row index of each local row (padded time = row // B).
        rvec = lax.broadcasted_iota(jnp.int32, (rows_total, 1), 0) + i * rows

        parts = []
        if has_left:
            parts.append(l_ref[...])
        parts.append(x_ref[...])
        if has_right:
            parts.append(r_ref[...])
        xv = jnp.concatenate(parts, axis=0) if len(parts) > 1 else parts[0]
        xv = xv.astype(jnp.float32)                        # (rows_total, Cin)

        if has_mask:                          # masked_fill BEFORE LayerNorm
            bd = bd_ref[...]
            keep = jnp.logical_and(rvec >= bd[:, 0:1], rvec < bd[:, 1:2])
            xv = xv * keep.astype(jnp.float32)

        # LayerNorm over channels (f32 math).  Fully-masked rows land exactly
        # on beta via rsqrt(0 + eps), matching the reference (eps-dependent by
        # construction on both sides).
        mean = jnp.mean(xv, axis=-1, keepdims=True)
        var = jnp.mean(jnp.square(xv - mean), axis=-1, keepdims=True)
        y = (xv - mean) * lax.rsqrt(var + LN_EPS)
        y = y * g_ref[...] + bt_ref[...]

        # Conv zero-padding rows (x time outside [0, T)) become true zeros;
        # this also neutralizes garbage from clamped / partial halo reads.
        valid = jnp.logical_and(rvec >= pad * B, rvec < (pad + T) * B)
        y = jnp.where(valid, y, 0.0).astype(jnp.bfloat16)   # bf16 MXU operand

        if fuse_taps and K > 1:
            # im2col: one (rows, K*Cin) @ (K*Cin, Cout) matmul.
            lhs = jnp.concatenate([y[k * B:k * B + rows] for k in range(K)],
                                  axis=1)
            acc = jnp.dot(lhs, w_ref[...], preferred_element_type=jnp.float32)
        else:
            # K accumulating 128-deep dots (preferred on v5e).
            acc = jnp.dot(y[0:rows], w_ref[0:Cin, :],
                          preferred_element_type=jnp.float32)
            for k in range(1, K):
                acc = acc + jnp.dot(y[k * B:k * B + rows],
                                    w_ref[k * Cin:(k + 1) * Cin, :],
                                    preferred_element_type=jnp.float32)
        o_ref[...] = (acc + bs_ref[...]).astype(o_ref.dtype)

    # ---- per-generation VMEM budget (v7x: 64 MiB/TC, v5e/v6e: 128 MiB) ----
    try:
        vmem_cap = int(pltpu.get_tpu_info().vmem_capacity_bytes)
    except Exception:
        vmem_cap = 64 * 2**20
    vmem_limit = int(max(32 * 2**20, min(0.85 * vmem_cap, 100 * 2**20)))

    out_flat = pl.pallas_call(
        kernel,
        out_shape=jax.ShapeDtypeStruct((T_out * B, Cout), out_dtype),
        grid_spec=pltpu.PrefetchScalarGridSpec(
            num_scalar_prefetch=0,
            grid=(nT,),
            in_specs=in_specs,
            out_specs=pl.BlockSpec((rows, Cout), lambda i: (i, 0)),
        ),
        compiler_params=pltpu.CompilerParams(
            dimension_semantics=("parallel",),
            vmem_limit_bytes=vmem_limit,
        ),
    )(*inputs)

    return out_flat.reshape(T_out, B, Cout)


def reference_forward(x, encoder_padding_mask, gamma, beta, weight, bias):
    """Pure-JAX f32 reference with identical semantics (for verification)."""
    T, B, Cin = x.shape
    K, _, Cout = weight.shape
    pad = K // 2
    T_out = T + 2 * pad - (K - 1)
    xf = x.astype(jnp.float32)
    if encoder_padding_mask is not None:
        keep = 1.0 - encoder_padding_mask.T.astype(jnp.float32)
        xf = xf * keep[:, :, None]
    mean = xf.mean(-1, keepdims=True)
    var = ((xf - mean) ** 2).mean(-1, keepdims=True)
    y = (xf - mean) / jnp.sqrt(var + LN_EPS) * gamma + beta
    ypad = jnp.pad(y, ((pad, pad), (0, 0), (0, 0)))
    out = sum(jnp.einsum('tbc,co->tbo', ypad[k:k + T_out],
                         weight[k].astype(jnp.float32))
              for k in range(K)) + bias
    return out


if __name__ == "__main__":
    # Small, lane-friendly shapes consistent with ConvLayer(c_in, c_out, K).
    K = 3
    T, B, C_IN, C_OUT = 64, 8, 128, 128
    dropout = 0.0

    key = jax.random.PRNGKey(0)
    kx, kw, kx2 = jax.random.split(key, 3)

    x = jax.random.normal(kx, (T, B, C_IN), jnp.float32)

    # Deterministic params matching the module __init__:
    #   conv.weight ~ N(0, std), std = sqrt(4*(1-dropout)/(K*c_in)),
    #   conv.bias = 0, LayerNorm gamma = 1, beta = 0.
    std = math.sqrt(4 * (1.0 - dropout) / (K * C_IN))
    weight = std * jax.random.normal(kw, (K, C_IN, C_OUT), jnp.float32)
    bias = jnp.zeros((C_OUT,), jnp.float32)
    gamma = jnp.ones((C_IN,), jnp.float32)
    beta = jnp.zeros((C_IN,), jnp.float32)

    # encoder_padding_mask: (B, T) bool, True where padded (trailing pad).
    pad_lens = jnp.array([0, 3, 7, 0, 16, 1, 0, 5])
    enc_mask = jnp.arange(T)[None, :] >= (T - pad_lens)[:, None]

    # 1) masked path, fused im2col matmul, 4 pipelined grid steps.
    out = conv_layer_forward(x, enc_mask, gamma, beta, weight, bias,
                             time_tile=16)
    out = jax.block_until_ready(out)
    ref = reference_forward(x, enc_mask, gamma, beta, weight, bias)
    assert out.shape == ref.shape, (out.shape, ref.shape)
    err = jnp.max(jnp.abs(out - ref))
    assert jnp.allclose(out, ref, atol=5e-2, rtol=5e-2), f"max err = {err}"

    # 2) no-mask specialization + K accumulating dots + even-nT retiling
    #    (T_out=40 with tile 16 -> retiled to 10 so the grid has 4 steps).
    T2 = 40
    x_b = jax.random.normal(kx2, (T2, B, C_IN), jnp.float32)
    out2 = conv_layer_forward(x_b, None, gamma, beta, weight, bias,
                              time_tile=16, fuse_taps=False)
    out2 = jax.block_until_ready(out2)
    ref2 = reference_forward(x_b, None, gamma, beta, weight, bias)
    assert out2.shape == ref2.shape, (out2.shape, ref2.shape)
    err2 = jnp.max(jnp.abs(out2 - ref2))
    assert jnp.allclose(out2, ref2, atol=5e-2, rtol=5e-2), f"max err = {err2}"

    print("KERNEL_OK")
</pallas_src>

<mosaic_0001>
module attributes {stable_mosaic.version = 11 : i64} {
  func.func @kernel(%arg0: i32, %arg1: memref<128x128xf32, #tpu.memory_space<vmem>>, %arg2: memref<1x8x128xf32, #tpu.memory_space<vmem>>, %arg3: memref<1x8x128xf32, #tpu.memory_space<vmem>>, %arg4: memref<144x2xi32, #tpu.memory_space<vmem>>, %arg5: memref<1x128xf32, #tpu.memory_space<vmem>>, %arg6: memref<1x128xf32, #tpu.memory_space<vmem>>, %arg7: memref<384x128xbf16, #tpu.memory_space<vmem>>, %arg8: memref<1x128xf32, #tpu.memory_space<vmem>>, %arg9: memref<128x128xf32, #tpu.memory_space<vmem>>) attributes {dimension_semantics = [#tpu.dimension_semantics<parallel>], iteration_bounds = array<i64: 4>, scalar_prefetch = 0 : i64, scratch_operands = 0 : i64, tpu.core_type = #tpu.core_type<tc>, window_params = [{transform_indices = @transform_0, window_bounds = array<i64: 128, 128>}, {transform_indices = @transform_1, window_bounds = array<i64: 1, 8, 128>}, {transform_indices = @transform_2, window_bounds = array<i64: 1, 8, 128>}, {pipeline_mode = #tpu.pipeline_mode<synchronous>, transform_indices = @transform_3, window_bounds = array<i64: 144, 2>}, {pipeline_mode = #tpu.pipeline_mode<synchronous>, transform_indices = @transform_4, window_bounds = array<i64: 1, 128>}, {pipeline_mode = #tpu.pipeline_mode<synchronous>, transform_indices = @transform_5, window_bounds = array<i64: 1, 128>}, {pipeline_mode = #tpu.pipeline_mode<synchronous>, transform_indices = @transform_6, window_bounds = array<i64: 384, 128>}, {pipeline_mode = #tpu.pipeline_mode<synchronous>, transform_indices = @transform_7, window_bounds = array<i64: 1, 128>}, {transform_indices = @transform_8, window_bounds = array<i64: 128, 128>}]} {
    %0 = tpu.iota {dimensions = array<i32: 0>} : vector<144x1xi32>
    %c128_i32 = arith.constant 128 : i32
    %1 = arith.muli %arg0, %c128_i32 : i32
    %2 = vector.broadcast %1 : i32 to vector<144x1xi32>
    %3 = arith.addi %0, %2 : vector<144x1xi32>
    %c0 = arith.constant 0 : index
    %c0_0 = arith.constant 0 : index
    %c0_1 = arith.constant 0 : index
    %4 = vector.load %arg2[%c0, %c0_0, %c0_1] : memref<1x8x128xf32, #tpu.memory_space<vmem>>, vector<1x8x128xf32>
    %5 = vector.shape_cast %4 : vector<1x8x128xf32> to vector<8x128xf32>
    %c0_2 = arith.constant 0 : index
    %c0_3 = arith.constant 0 : index
    %6 = vector.load %arg1[%c0_2, %c0_3] : memref<128x128xf32, #tpu.memory_space<vmem>>, vector<128x128xf32>
    %c0_4 = arith.constant 0 : index
    %c0_5 = arith.constant 0 : index
    %c0_6 = arith.constant 0 : index
    %7 = vector.load %arg3[%c0_4, %c0_5, %c0_6] : memref<1x8x128xf32, #tpu.memory_space<vmem>>, vector<1x8x128xf32>
    %8 = vector.shape_cast %7 : vector<1x8x128xf32> to vector<8x128xf32>
    %9 = tpu.concatenate %5, %6, %8 in 0 : vector<8x128xf32>, vector<128x128xf32>, vector<8x128xf32> -> vector<144x128xf32>
    %c0_7 = arith.constant 0 : index
    %c0_8 = arith.constant 0 : index
    %10 = vector.load %arg4[%c0_7, %c0_8] : memref<144x2xi32, #tpu.memory_space<vmem>>, vector<144x2xi32>
    %11 = vector.extract_strided_slice %10 {offsets = [0, 0], sizes = [144, 1], strides = [1, 1]} : vector<144x2xi32> to vector<144x1xi32>
    %12 = arith.cmpi sge, %3, %11 : vector<144x1xi32>
    %13 = vector.extract_strided_slice %10 {offsets = [0, 1], sizes = [144, 1], strides = [1, 1]} : vector<144x2xi32> to vector<144x1xi32>
    %14 = arith.cmpi slt, %3, %13 : vector<144x1xi32>
    %15 = arith.andi %12, %14 : vector<144x1xi1>
    %16 = arith.extui %15 : vector<144x1xi1> to vector<144x1xi32>
    %17 = arith.sitofp %16 : vector<144x1xi32> to vector<144x1xf32>
    %18 = vector.broadcast %17 : vector<144x1xf32> to vector<144x128xf32>
    %19 = arith.mulf %9, %18 : vector<144x128xf32>
    %cst = arith.constant dense<0.000000e+00> : vector<144xf32>
    %20 = vector.multi_reduction <add>, %19, %cst [1] : vector<144x128xf32> to vector<144xf32>
    %21 = vector.shape_cast %20 : vector<144xf32> to vector<144x1xf32>
    %cst_9 = arith.constant 1.280000e+02 : f32
    %22 = vector.broadcast %cst_9 : f32 to vector<144x1xf32>
    %23 = arith.divf %21, %22 : vector<144x1xf32>
    %24 = vector.broadcast %23 : vector<144x1xf32> to vector<144x128xf32>
    %25 = arith.subf %19, %24 : vector<144x128xf32>
    %26 = arith.mulf %25, %25 : vector<144x128xf32>
    %cst_10 = arith.constant dense<0.000000e+00> : vector<144xf32>
    %27 = vector.multi_reduction <add>, %26, %cst_10 [1] : vector<144x128xf32> to vector<144xf32>
    %28 = vector.shape_cast %27 : vector<144xf32> to vector<144x1xf32>
    %cst_11 = arith.constant 1.280000e+02 : f32
    %29 = vector.broadcast %cst_11 : f32 to vector<144x1xf32>
    %30 = arith.divf %28, %29 : vector<144x1xf32>
    %31 = vector.broadcast %23 : vector<144x1xf32> to vector<144x128xf32>
    %32 = arith.subf %19, %31 : vector<144x128xf32>
    %cst_12 = arith.constant 9.99999974E-6 : f32
    %33 = vector.broadcast %cst_12 : f32 to vector<144x1xf32>
    %34 = arith.addf %30, %33 : vector<144x1xf32>
    %35 = math.rsqrt %34 : vector<144x1xf32>
    %36 = vector.broadcast %35 : vector<144x1xf32> to vector<144x128xf32>
    %37 = arith.mulf %32, %36 : vector<144x128xf32>
    %c0_13 = arith.constant 0 : index
    %c0_14 = arith.constant 0 : index
    %38 = vector.load %arg5[%c0_13, %c0_14] : memref<1x128xf32, #tpu.memory_space<vmem>>, vector<1x128xf32>
    %39 = vector.broadcast %38 : vector<1x128xf32> to vector<144x128xf32>
    %40 = arith.mulf %37, %39 : vector<144x128xf32>
    %c0_15 = arith.constant 0 : index
    %c0_16 = arith.constant 0 : index
    %41 = vector.load %arg6[%c0_15, %c0_16] : memref<1x128xf32, #tpu.memory_space<vmem>>, vector<1x128xf32>
    %42 = vector.broadcast %41 : vector<1x128xf32> to vector<144x128xf32>
    %43 = arith.addf %40, %42 : vector<144x128xf32>
    %c8_i32 = arith.constant 8 : i32
    %44 = vector.broadcast %c8_i32 : i32 to vector<144x1xi32>
    %45 = arith.cmpi sge, %3, %44 : vector<144x1xi32>
    %c520_i32 = arith.constant 520 : i32
    %46 = vector.broadcast %c520_i32 : i32 to vector<144x1xi32>
    %47 = arith.cmpi slt, %3, %46 : vector<144x1xi32>
    %48 = arith.andi %45, %47 : vector<144x1xi1>
    %cst_17 = arith.constant 0.000000e+00 : f32
    %49 = vector.shape_cast %48 : vector<144x1xi1> to vector<144x1xi1>
    %50 = vector.broadcast %49 : vector<144x1xi1> to vector<144x128xi1>
    %51 = vector.broadcast %cst_17 : f32 to vector<144x128xf32>
    %52 = arith.select %50, %43, %51 : vector<144x128xi1>, vector<144x128xf32>
    %53 = arith.truncf %52 : vector<144x128xf32> to vector<144x128xbf16>
    %54 = vector.extract_strided_slice %53 {offsets = [0, 0], sizes = [128, 128], strides = [1, 1]} : vector<144x128xbf16> to vector<128x128xbf16>
    %55 = vector.extract_strided_slice %53 {offsets = [8, 0], sizes = [128, 128], strides = [1, 1]} : vector<144x128xbf16> to vector<128x128xbf16>
    %56 = vector.extract_strided_slice %53 {offsets = [16, 0], sizes = [128, 128], strides = [1, 1]} : vector<144x128xbf16> to vector<128x128xbf16>
    %57 = tpu.concatenate %54, %55, %56 in 1 : vector<128x128xbf16>, vector<128x128xbf16>, vector<128x128xbf16> -> vector<128x384xbf16>
    %c0_18 = arith.constant 0 : index
    %c0_19 = arith.constant 0 : index
    %58 = vector.load %arg7[%c0_18, %c0_19] : memref<384x128xbf16, #tpu.memory_space<vmem>>, vector<384x128xbf16>
    %cst_20 = arith.constant dense<0.000000e+00> : vector<128x128xf32>
    %59 = tpu.matmul %57, %58, %cst_20 {dimension_numbers = #tpu.dot_dimension_numbers<[1], [0], [0], [1], [0, 0, 1, 1], [], []>} : vector<128x384xbf16>, vector<384x128xbf16>, vector<128x128xf32> -> vector<128x128xf32>
    %c0_21 = arith.constant 0 : index
    %c0_22 = arith.constant 0 : index
    %60 = vector.load %arg8[%c0_21, %c0_22] : memref<1x128xf32, #tpu.memory_space<vmem>>, vector<1x128xf32>
    %61 = vector.broadcast %60 : vector<1x128xf32> to vector<128x128xf32>
    %62 = arith.addf %59, %61 : vector<128x128xf32>
    %c0_23 = arith.constant 0 : index
    %c0_24 = arith.constant 0 : index
    %63 = vector.load %arg9[%c0_23, %c0_24] : memref<128x128xf32, #tpu.memory_space<vmem>>, vector<128x128xf32>
    tpu.vector_store %arg9[%c0_23, %c0_24], %62 {strides = array<i32>} : memref<128x128xf32, #tpu.memory_space<vmem>>, vector<128x128xf32>,
    return
  }
  func.func @transform_0(%arg0: i32) -> (i32, i32) {
    %c3_i32 = arith.constant 3 : i32
    %0 = arith.minsi %arg0, %c3_i32 : i32
    %c0_i32 = arith.constant 0 : i32
    %c0_i32_0 = arith.constant 0 : i32
    return %0, %c0_i32 : i32, i32
  }
  func.func @transform_1(%arg0: i32) -> (i32, i32, i32) {
    %c0_i32 = arith.constant 0 : i32
    %c0_i32_0 = arith.constant 0 : i32
    %c0_i32_1 = arith.constant 0 : i32
    return %arg0, %c0_i32, %c0_i32_0 : i32, i32, i32
  }
  func.func @transform_2(%arg0: i32) -> (i32, i32, i32) {
    %c0_i32 = arith.constant 0 : i32
    %c0_i32_0 = arith.constant 0 : i32
    %c0_i32_1 = arith.constant 0 : i32
    return %arg0, %c0_i32, %c0_i32_0 : i32, i32, i32
  }
  func.func @transform_3(%arg0: i32) -> (i32, i32) {
    %c0_i32 = arith.constant 0 : i32
    %c0_i32_0 = arith.constant 0 : i32
    %c0_i32_1 = arith.constant 0 : i32
    return %c0_i32, %c0_i32_0 : i32, i32
  }
  func.func @transform_4(%arg0: i32) -> (i32, i32) {
    %c0_i32 = arith.constant 0 : i32
    %c0_i32_0 = arith.constant 0 : i32
    %c0_i32_1 = arith.constant 0 : i32
    return %c0_i32, %c0_i32_0 : i32, i32
  }
  func.func @transform_5(%arg0: i32) -> (i32, i32) {
    %c0_i32 = arith.constant 0 : i32
    %c0_i32_0 = arith.constant 0 : i32
    %c0_i32_1 = arith.constant 0 : i32
    return %c0_i32, %c0_i32_0 : i32, i32
  }
  func.func @transform_6(%arg0: i32) -> (i32, i32) {
    %c0_i32 = arith.constant 0 : i32
    %c0_i32_0 = arith.constant 0 : i32
    %c0_i32_1 = arith.constant 0 : i32
    return %c0_i32, %c0_i32_0 : i32, i32
  }
  func.func @transform_7(%arg0: i32) -> (i32, i32) {
    %c0_i32 = arith.constant 0 : i32
    %c0_i32_0 = arith.constant 0 : i32
    %c0_i32_1 = arith.constant 0 : i32
    return %c0_i32, %c0_i32_0 : i32, i32
  }
  func.func @transform_8(%arg0: i32) -> (i32, i32) {
    %c0_i32 = arith.constant 0 : i32
    %c0_i32_0 = arith.constant 0 : i32
    return %arg0, %c0_i32 : i32, i32
  }
}

</mosaic_0001>

<bundles_post_ra>
// kernel: tpu_custom_call.1
= control target key start
LH: loop header
LB: loop body
LE: loop exit
PB: predicated region body
PF: predicated region fallthrough
CT: control target
= control target key end

     0   :  { %s3456_s0 = inlined_call_operand.hbm [shape: f32[512,128], index: 0, kind: input, shape index: {}]   ;;  %s3457_s1 = inlined_call_operand.vmem [shape: f32[4,8,128], index: 1, kind: input, shape index: {}]   ;;  %s3458_s2 = inlined_call_operand.vmem [shape: f32[4,8,128], index: 2, kind: input, shape index: {}]   ;;  %s3459_s3 = inlined_call_operand.vmem [shape: s32[144,2], index: 3, kind: input, shape index: {}]   ;;  %s3460_s4 = inlined_call_operand.vmem [shape: f32[1,128], index: 4, kind: input, shape index: {}]   ;;  %s3461_s5 = inlined_call_operand.vmem [shape: f32[1,128], index: 5, kind: input, shape index: {}]   ;;  %s3462_s6 = inlined_call_operand.hbm [shape: bf16[384,128], index: 6, kind: input, shape index: {}]   ;;  %s3463_s7 = inlined_call_operand.vmem [shape: f32[1,128], index: 7, kind: input, shape index: {}]   ;;  %s3464_s8 = inlined_call_operand.hbm [shape: f32[512,128], index: 8, kind: output, shape index: {}]  }
   0x1   :  { %3480 = sst [smem:[#allocation13_spill]] %s3462_s6 }
   0x2   :  { %3481 = sst [smem:[#allocation14_spill]] %s3464_s8 }
   0x3   :  { %13 = vsyncpa [#allocation3], 0 }
   0x4   :  { %15 = vsyncpa [#allocation3 + $0x1], 0 }
   0x5   :  { %16 = vsyncpa [#allocation6], 0 }
   0x6   :  { %17 = vsyncpa [#allocation4], 0 }
   0x7   :  { %19 = vsyncpa [#allocation4 + $0x1], 0  ;;  %s2294_s27 = smov 0   ;;  %s2296_s28 = smov 0  }
   0x8   :  { %s2298_s29 = smov 0   ;;  %s2300_s30 = smov 0  }
   0x9   :  { %s2302_s9 = smov 0   ;;  %s2304_s10 = smov 0  }
   0xa   :  { %s2306_s11 = smov 0  }
   0xb LB: > { %3482 = sst [smem:[#allocation11_spill]] %s2211_s27  ;;  %s2328_s12 = sadd.s32 4294967295, %s2235_s11   ;;  %s2235_s11 = sphi %s2306_s11, %s3566_s11   ;;  %s2231_s10 = sphi %s2304_s10, %s3565_s10   ;;  %s2227_s9 = sphi %s2302_s9, %s3564_s9   ;;  %s2223_s30 = sphi %s2300_s30, %s3563_s30   ;;  %s2219_s29 = sphi %s2298_s29, %s3562_s29   ;;  %s2215_s28 = sphi %s2296_s28, %s3561_s28   ;;  %s2211_s27 = sphi %s2294_s27, %s3560_s27  }
   0xc   : > { %s1660_s13 = sadd.s32 4294967294, %s2235_s11   ;;  %p49_p0 = scmp.ne.s32.totalorder %s2227_s9, %s2223_s30 }
   0xd   : > { %p3465_p1 = scmp.eq.s32.totalorder %s2328_s12, 0  ;;  %p229_p2 = scmp.ne.s32.totalorder %s2219_s29, %s2215_s28 }
   0xe   : > { %p230_p4 = scmp.eq.s32.totalorder %s2328_s12, 3  ;;  %p235_p5 = scmp.ne.s32.totalorder %s2215_s28, %s2211_s27 }
   0xf   : > { %p2338_p3 = por %p3465_p1, %p49_p0  ;;  %p236_p6 = scmp.eq.s32.totalorder %s1660_s13, 3 }
  0x10   : > { %p2345_p7 = por %p230_p4, %p229_p2  ;;  %p1661_p8 = scmp.ge.s32.totalorder %s2235_s11, 1 }
  0x11   : > { %s3483_s15 = scalar_select %p2338_p3, 1, 0 }
  0x12   : > { %s3484_s16 = scalar_select %p2345_p7, 1, 0 }
  0x13   : > { %p2350_p9 = por %p236_p6, %p235_p5  ;;  %p243_p10 = scmp.lt.s32.totalorder %s2235_s11, 5 }
  0x14   : > { %s2237_s19 = smov [#allocation5]   ;;  %s2368_s22 = sadd.s32 1, %s2235_s11  }
  0x15   : > { %s3485_s17 = scalar_select %p2350_p9, 1, 0 }
  0x16   : > { %p2355_p11 = pnand %p1661_p8, %p243_p10  ;;  %s264_s20 = sshll.u32 %s2237_s19, 4  ;;  %s265_s20 = int_to_ptr.vmem [resolvable:$true] %s264_s20 }
  0x17   : > { %3486 = sst [smem:[#allocation12_spill]] %s3485_s17  ;;  %s3489_s6 = sld [smem:[#allocation13_spill]] }
  0x18   : > { %s3487_s18 = scalar_select %p2355_p11, 1, 0 }
  0x19   : > { %p1894_p12 = pneg %p2355_p11 }
  0x1b   : > { %p2363_p13 = pnand %p1894_p12, %p3465_p1 }
  0x1d   : > { %s2083_s25 = scalar_lea.hbm %s3489_s6, 3072  ;;  %p2085_p5 = pneg %p2363_p13 }
  0x1e   : > { %p2084_p4 = scmp.ne.s32.totalorder %s3489_s6, %s2083_s25  ;;  %p2090_p10 = scmp.lt.u32.totalorder %s2083_s25, %s3489_s6 }
  0x20   : > { %p2086_p6 = pnand %p2085_p5, %p2084_p4 }
  0x22   : > { %p2087_p8 = pneg %p2086_p6 }
  0x24   : > { %p2092_p12 = pnand %p2090_p10, %p2087_p8 }
  0x26   : > { %2095 = shalt.err (!%p2092_p12)
}
  0x27   : > { %s2096_s14 = scalar_lea.vmem %s265_s20, 3072  ;;  %p2104_p9 = scmp.lt.s32.totalorder %s265_s20, %s265_s20 }
  0x28   : > { %p2097_p1 = scmp.ne.s32.totalorder %s265_s20, %s2096_s14  ;;  %p2105_p7 = scmp.lt.s32.totalorder %s2096_s14, %s2096_s14 }
  0x2a   : > { %p2099_p2 = pnand %p2097_p1, %p2085_p5  ;;  %p2106_p3 = por %p2105_p7, %p2104_p9 }
  0x2c   : > { %p2100_p0 = pneg %p2099_p2 }
  0x2e   : > { %p2107_p11 = pnand %p2106_p3, %p2100_p0 }
  0x30   : > { %2110 = shalt.err (!%p2107_p11)
}
  0x31   : > { %s2238_s23 = smov 64   ;;  %s2239_s14 = smov 4  }
  0x32   : > { %1897 = dma.hbm_to_vmem [thread:$0]  (!%p2363_p13), %s3489_s6, 3072, %s265_s20, [#allocation6], %s2238_s23, %s2238_s23, %s2239_s14  }
  0x33   : > { %p3490_p1 = scmp.lt.s32.totalorder %s2235_s11, 3  ;;  %p3491_p3 = scmp.lt.s32.totalorder %s2368_s22, 3 }
  0x34   : > { %s36_s13 = sadd.s32 1, %s2231_s10  ;;  %p43_p7 = scmp.ne.s32.totalorder %s2231_s10, %s2227_s9 }
  0x35   : > { %s30_s26 = scalar_select %p3490_p1, %s2235_s11, 3 }
  0x36   : > { %s32_s30 = scalar_select %p3491_p3, %s2368_s22, 3 }
  0x37   : > { %p44_p9 = scmp.eq.s32.totalorder %s2235_s11, 0  ;;  %s216_s17 = ssub.s32 %s2235_s11, %s2368_s22 }
  0x38   : > { %s33_s19 = ssub.s32 %s30_s26, %s32_s30  ;;  %p217_p2 = scmp.eq.s32.totalorder %s216_s17, 0 }
  0x39   : > { %p34_p11 = scmp.eq.s32.totalorder %s33_s19, 0  ;;  %p45_p0 = por %p44_p9, %p43_p7 }
  0x3a   : > { %s3492_s8 = sadd.s32 1, %s2219_s29  ;;  %p1907_p4 = scmp.lt.s32.totalorder %s2235_s11, 4 }
  0x3b   : > { %s2401_s27 = scalar_select %p34_p11, %s2231_s10, %s36_s13  }
  0x3c   : > { %s2406_s21 = scalar_select %p217_p2, %s2219_s29, %s3492_s8  }
  0x3d   : > { %s281_s24 = sand.u32 1, %s2231_s10   ;;  %s1772_s23 = sshll.u32 %s30_s26, 11 }
  0x3e   : > { %s1664_s20 = sshll.u32 %s281_s24, 7  ;;  %s2413_s6 = scalar_lea.hbm %s3456_s0, %s1772_s23 }
  0x3f   : > { %s285_s30 = scalar_lea.vmem [#allocation2], %s1664_s20  ;;  %p2417_p13 = pnand %p1907_p4, %p45_p0 }
  0x40   : > { %s294_s17 = sshll.u32 %s285_s30, 4  ;;  %s2421_s26 = scalar_lea.sflag [#allocation3], %s281_s24  ;;  %s2415_s17 = int_to_ptr.vmem [resolvable:$true] %s294_s17 }
  0x41   : > { %s2111_s13 = scalar_lea.hbm %s2413_s6, 2048  ;;  %p2113_p6 = pneg %p2417_p13 }
  0x42   : > { %p2112_p5 = scmp.ne.s32.totalorder %s2413_s6, %s2111_s13  ;;  %s2116_s23 = scalar_lea.hbm %s3456_s0, 8192 }
  0x43   : > { %p2117_p12 = scmp.lt.u32.totalorder %s2413_s6, %s3456_s0  ;;  %p2118_p1 = scmp.lt.u32.totalorder %s2116_s23, %s2111_s13 }
  0x44   : > { %p2114_p8 = pnand %p2113_p6, %p2112_p5  ;;  %p2120_p7 = scmp.lt.u32.totalorder %s2111_s13, %s2413_s6 }
  0x45   : > { %p2119_p3 = por %p2118_p1, %p2117_p12 }
  0x46   : > { %p2115_p10 = pneg %p2114_p8 }
  0x47   : > { %p2121_p9 = por %p2120_p7, %p2119_p3 }
  0x49   : > { %p2122_p11 = pnand %p2121_p9, %p2115_p10 }
  0x4b   : > { %2125 = shalt.err (!%p2122_p11)
}
  0x4c   : > { %s2126_s24 = scalar_lea.vmem %s2415_s17, 2048  ;;  %s2240_s30 = smov [#allocation2]  }
  0x4d   : > { %p2127_p0 = scmp.ne.s32.totalorder %s2415_s17, %s2126_s24  ;;  %s2131_s19 = sshll.u32 %s2240_s30, 4  ;;  %s2132_s19 = int_to_ptr.vmem [resolvable:$false] %s2131_s19 }
  0x4e   : > { %s2133_s20 = scalar_lea.vmem %s2132_s19, 4096  ;;  %p2134_p5 = scmp.lt.s32.totalorder %s2415_s17, %s2132_s19 }
  0x4f   : > { %p2129_p2 = pnand %p2127_p0, %p2113_p6  ;;  %p2135_p8 = scmp.lt.s32.totalorder %s2133_s20, %s2126_s24 }
  0x51   : > { %p2130_p4 = pneg %p2129_p2  ;;  %p2136_p12 = por %p2135_p8, %p2134_p5 }
  0x53   : > { %p2137_p1 = pnand %p2136_p12, %p2130_p4 }
  0x55   : > { %2140 = shalt.err (!%p2137_p1)
}
  0x56   : > { %s2241_s13 = smov 128   ;;  %s2242_s23 = smov 8  }
  0x57   : > { %1901 = dma.hbm_to_vmem [thread:$0]  (!%p2417_p13), %s2413_s6, 2048, %s2415_s17, %s2421_s26, %s2241_s13, %s2241_s13, %s2242_s23  }
  0x58   : > { %p3494_p6 = scmp.ne.s32.totalorder %s3487_s18, 0 }
  0x59   : > { %s322_s14 = sand.u32 (!%p3494_p6), 1, %s2227_s9   ;;  %p3495_p10 = scmp.ne.s32.totalorder (!%p3494_p6), %s3483_s15, 0 }
  0x5a   : > { %320 = sbr.rel (%p3494_p6) target bundleno = 986 (0x3da), region = 52  ;;  %s1668_s25 = sshll.u32 (!%p3494_p6), %s322_s14, 7 }
  0x5b   : > { %s323_s30 = scalar_lea.sflag (!%p3494_p6), [#allocation3], %s322_s14  ;;  %s2452_s24 = scalar_lea.vmem (!%p3494_p6), [#allocation2], %s1668_s25 }
  0x61   : > { %2198 = dma.done.wait (%p3495_p10), %s323_s30, 2048  }
  0x62   : > { %2200 = vsyncadd (%p3495_p10), %s323_s30, 4294965248  ;;  %p3496_p3 = scmp.eq.s32.totalorder %s2328_s12, 0 }
  0x64   : > { %2202 = dma.done.wait (%p3496_p3), [#allocation6], 3072   ;;  %p3497_p13 = pmov %p3496_p3 }
  0x65   : > { %v384_v0 = vlaneseq  ;;  %s1673_s6 = sshll.u32 %s2328_s12, 7  ;;  %v2243_v2 = vmov 0   ;;  %v2492_v15 = vld [vmem:[%s3459_s3 + $0x10] sm:$0xff]  ;;  %v2497_v16 = vld [vmem:[%s3459_s3] sm:$0xff]  ;;  %v2502_v17 = vld [vmem:[%s3459_s3 + $0x18] sm:$0xff]  ;;  %s2244_s18 = smov 127  }
  0x66   : > { %2204 = vsyncadd (%p3497_p13), [#allocation6], 4294964224  ;;  %v2463_v1 = vstv %s1673_s6  ;;  %1982 = vset.pattern.permute.xlu1 %v2243_v2  ;;  %1976 = vset.pattern.permute.xlu0 %v2243_v2  ;;  %v2520_v21 = vld [vmem:[%s3459_s3 + $0x8] sm:$0xff]  ;;  %v2530_v23 = vld [vmem:[%s3459_s3 + $0x20] sm:$0xff]  ;;  %p374_p7 = scmp.lt.s32.totalorder %s2328_s12, 3  ;;  %s368_s25 = sand.u32 1, %s2215_s28  }
  0x67   : > { %v2467_v3 = vshrl.u32 %v384_v0, 7  ;;  %v2525_v22 = vld [vmem:[%s3459_s3 + $0x28] sm:$0xff]  ;;  %v2542_v27 = vld [vmem:[%s3459_s3 + $0x38] sm:$0xff]  ;;  %v2558_v31 = vld [vmem:[%s3459_s3 + $0x30] sm:$0xff]  ;;  %s1773_s17 = sshll.u32 %s2328_s12, 11  ;;  %s3406_s13 = scalar_lea.sflag [#allocation4], %s368_s25 }
  0x68   : > { %v2568_v33 = vld [vmem:[%s3459_s3 + $0x48] sm:$0xff]  ;;  %v2577_v38 = vld [vmem:[%s3459_s3 + $0x40] sm:$0xff]  ;;  %v2582_v39 = vld [vmem:[%s3459_s3 + $0x58] sm:$0xff]  ;;  %p3555_p11 = scmp.ne.s32.totalorder %s3484_s16, 0  ;;  %s2246_s23 = smov [#allocation7]  }
  0x69   : > { %v387_v4 = vadd.s32 16, %v2467_v3  ;;  %v2472_v5 = vadd.s32 %v2463_v1, %v2467_v3  ;;  %v388_v6 = vadd.s32 24, %v2467_v3  ;;  %v386_v7 = vadd.s32 8, %v2467_v3  ;;  %v2599_v44 = vld [vmem:[%s3459_s3 + $0x50] sm:$0xff]  ;;  %v2617_v49 = vld [vmem:[%s3459_s3 + $0x68] sm:$0xff]  ;;  %v2627_v51 = vld [vmem:[%s3459_s3 + $0x60] sm:$0xff] }
  0x6a   : > { %v390_v8 = vadd.s32 40, %v2467_v3  ;;  %v389_v9 = vadd.s32 32, %v2467_v3  ;;  %v392_v10 = vadd.s32 56, %v2467_v3  ;;  %v391_v14 = vadd.s32 48, %v2467_v3  ;;  %v2657_v63 = vld [vmem:[%s3459_s3 + $0x78] sm:$0xff]  ;;  %v2662_v0 = vld [vmem:[%s3459_s3 + $0x70] sm:$0xff] }
  0x6b   : > { %v2480_v11 = vadd.s32 %v2463_v1, %v387_v4  ;;  %v2483_v12 = vadd.s32 %v2463_v1, %v388_v6  ;;  %v2486_v13 = vadd.s32 %v2463_v1, %v386_v7  ;;  %v394_v20 = vadd.s32 72, %v2467_v3  ;;  %s2145_s14 = sshll.u32 %s2246_s23, 4  ;;  %s2146_s14 = int_to_ptr.vmem [resolvable:$false] %s2145_s14 }
  0x6c   : > { %v2505_v18 = vadd.s32 %v2463_v1, %v390_v8  ;;  %v2508_v19 = vadd.s32 %v2463_v1, %v389_v9  ;;  %vm477_vm1 = vcmp.lt.s32.totalorder %v2472_v5, %v2497_v16  ;;  %v2533_v24 = vadd.s32 %v2463_v1, %v392_v10  ;;  %v2685_v8 = vld [vmem:[%s3459_s3 + $0x88] sm:$0xff]  ;;  %v2690_v9 = vld [vmem:[%s3459_s3 + $0x80] sm:$0xff]  ;;  %s2147_s30 = scalar_lea.vmem %s2146_s14, 4096 }
  0x6d   : > { %vm479_vm0 = vcmp.lt.s32.totalorder %v2480_v11, %v2492_v15  ;;  %vm480_vm2 = vcmp.lt.s32.totalorder %v2483_v12, %v2502_v17  ;;  %v495_v26 = vsel %vm477_vm1, 1, %v2243_v2  ;;  %vm478_vm3 = vcmp.lt.s32.totalorder %v2486_v13, %v2520_v21 }
  0x6e   : > { %v497_v25 = vsel %vm479_vm0, 1, %v2243_v2  ;;  %513 = vrot.lane.b32.xlu0 %v495_v26, %s2244_s18  ;;  %vm482_vm4 = vcmp.lt.s32.totalorder %v2505_v18, %v2525_v22  ;;  %vm481_vm5 = vcmp.lt.s32.totalorder %v2508_v19, %v2530_v23  ;;  %v2551_v28 = vadd.s32 %v2463_v1, %v391_v14 }
  0x6f   : > { %517 = vrot.lane.b32.xlu1 %v497_v25, %s2244_s18  ;;  %v498_v29 = vsel %vm480_vm2, 1, %v2243_v2  ;;  %v496_v30 = vsel %vm478_vm3, 1, %v2243_v2  ;;  %v2561_v32 = vadd.s32 %v2463_v1, %v394_v20  ;;  %vm484_vm6 = vcmp.lt.s32.totalorder %v2533_v24, %v2542_v27 }
  0x70   : > { %v393_v34 = vadd.s32 64, %v2467_v3  ;;  %v396_v35 = vadd.s32 88, %v2467_v3  ;;  %v500_v36 = vsel %vm482_vm4, 1, %v2243_v2  ;;  %v499_v37 = vsel %vm481_vm5, 1, %v2243_v2 }
  0x71   : > { %v395_v40 = vadd.s32 80, %v2467_v3  ;;  %v398_v41 = vadd.s32 104, %v2467_v3  ;;  %vm483_vm7 = vcmp.lt.s32.totalorder %v2551_v28, %v2558_v31  ;;  %v397_v45 = vadd.s32 96, %v2467_v3 }
  0x72   : > { %515 = vrot.lane.b32.xlu0 %v496_v30, %s2244_s18  ;;  %v2591_v42 = vadd.s32 %v2463_v1, %v393_v34  ;;  %v2594_v43 = vadd.s32 %v2463_v1, %v396_v35  ;;  %v502_v46 = vsel %vm484_vm6, 1, %v2243_v2  ;;  %vm486_vm8 = vcmp.lt.s32.totalorder %v2561_v32, %v2568_v33 }
  0x73   : > { %519 = vrot.lane.b32.xlu1 %v498_v29, %s2244_s18  ;;  %v2609_v47 = vadd.s32 %v2463_v1, %v395_v40  ;;  %v2612_v48 = vadd.s32 %v2463_v1, %v398_v41  ;;  %v501_v50 = vsel %vm483_vm7, 1, %v2243_v2  ;;  %v504_v52 = vsel %vm486_vm8, 1, %v2243_v2 }
  0x74   : > { %vm485_vm9 = vcmp.lt.s32.totalorder %v2591_v42, %v2577_v38  ;;  %vm488_vm10 = vcmp.lt.s32.totalorder %v2594_v43, %v2582_v39  ;;  %v2633_v53 = vadd.s32 %v2463_v1, %v397_v45  ;;  %v400_v54 = vadd.s32 120, %v2467_v3 }
  0x75   : > { %vm487_vm11 = vcmp.lt.s32.totalorder %v2609_v47, %v2599_v44  ;;  %vm490_vm12 = vcmp.lt.s32.totalorder %v2612_v48, %v2617_v49  ;;  %v399_v55 = vadd.s32 112, %v2467_v3  ;;  %v402_v56 = vadd.s32 136, %v2467_v3 }
  0x76   : > { %521 = vrot.lane.b32.xlu0 %v499_v37, %s2244_s18  ;;  %v503_v57 = vsel %vm485_vm9, 1, %v2243_v2  ;;  %v506_v58 = vsel %vm488_vm10, 1, %v2243_v2  ;;  %v505_v59 = vsel %vm487_vm11, 1, %v2243_v2  ;;  %v508_v60 = vsel %vm490_vm12, 1, %v2243_v2 }
  0x77   : > { %523 = vrot.lane.b32.xlu1 %v500_v36, %s2244_s18  ;;  %vm489_vm13 = vcmp.lt.s32.totalorder %v2633_v53, %v2627_v51  ;;  %v401_v62 = vadd.s32 128, %v2467_v3  ;;  %v2665_v4 = vadd.s32 %v2463_v1, %v400_v54  ;;  %v2668_v6 = vadd.s32 %v2463_v1, %v399_v55 }
  0x78   : > { %v507_v61 = vsel %vm489_vm13, 1, %v2243_v2  ;;  %v2677_v3 = vadd.s32 %v2463_v1, %v402_v56  ;;  %vm461_vm2 = vcmp.ge.s32.totalorder %v2480_v11, %v2492_v15  ;;  %vm459_vm5 = vcmp.ge.s32.totalorder %v2472_v5, %v2497_v16 }
  0x79   : > { %vm492_vm14 = vcmp.lt.s32.totalorder %v2665_v4, %v2657_v63  ;;  %vm491_vm15 = vcmp.lt.s32.totalorder %v2668_v6, %v2662_v0  ;;  %v2680_v7 = vadd.s32 %v2463_v1, %v401_v62  ;;  %vm462_vm7 = vcmp.ge.s32.totalorder %v2483_v12, %v2502_v17 }
  0x7a   : > { %525 = vrot.lane.b32.xlu0 %v501_v50, %s2244_s18  ;;  %v510_v10 = vsel %vm492_vm14, 1, %v2243_v2  ;;  %v509_v14 = vsel %vm491_vm15, 1, %v2243_v2  ;;  %vm494_vm0 = vcmp.lt.s32.totalorder %v2677_v3, %v2685_v8  ;;  %vm460_vm8 = vcmp.ge.s32.totalorder %v2486_v13, %v2520_v21 }
  0x7b   : > { %527 = vrot.lane.b32.xlu1 %v502_v46, %s2244_s18  ;;  %vm493_vm1 = vcmp.lt.s32.totalorder %v2680_v7, %v2690_v9  ;;  %v512_v1 = vsel %vm494_vm0, 1, %v2243_v2  ;;  %v2245_v30 = vmov 0.0   ;;  %vm464_vm14 = vcmp.ge.s32.totalorder %v2505_v18, %v2525_v22 }
  0x7c   : > { %v511_v20 = vsel %vm493_vm1, 1, %v2243_v2  ;;  %vm463_vm15 = vcmp.ge.s32.totalorder %v2508_v19, %v2530_v23 }
  0x7e   : > { %529 = vrot.lane.b32.xlu0 %v503_v57, %s2244_s18 }
  0x7f   : > { %531 = vrot.lane.b32.xlu1 %v504_v52, %s2244_s18 }
  0x82   : > { %533 = vrot.lane.b32.xlu0 %v505_v59, %s2244_s18 }
  0x83   : > { %535 = vrot.lane.b32.xlu1 %v506_v58, %s2244_s18 }
  0x86   : > { %537 = vrot.lane.b32.xlu0 %v507_v61, %s2244_s18 }
  0x87   : > { %539 = vrot.lane.b32.xlu1 %v508_v60, %s2244_s18 }
  0x8a   : > { %541 = vrot.lane.b32.xlu0 %v509_v14, %s2244_s18 }
  0x8b   : > { %543 = vrot.lane.b32.xlu1 %v510_v10, %s2244_s18 }
  0x8e   : > { %545 = vrot.lane.b32.xlu0 %v511_v20, %s2244_s18 }
  0x8f   : > { %547 = vrot.lane.b32.xlu1 %v512_v1, %s2244_s18  ;;  %s2762_s18 = scalar_select %p374_p7, %s2328_s12, 3 }
  0x91   : > { %s1671_s6 = sshll.u32 %s2762_s18, 3 }
  0x92   : > { %s377_s8 = scalar_lea.vmem %s3457_s1, %s1671_s6  ;;  %s381_s20 = scalar_lea.vmem %s3458_s2, %s1671_s6 }
  0x93   : > { %s1670_s6 = sshll.u32 %s368_s25, 7 }
  0x94   : > { %s3363_s15 = scalar_lea.vmem [#allocation7], %s1670_s6 }
  0xe0   : > { %v514_v26 = vpop.permute.xlu0 %513 }
  0xe1   : > { %v518_v25 = vpop.permute.xlu1 %517  ;;  %vm549_vm6 = vcmp.ne.s32.totalorder %v514_v26, 0 }
  0xe2   : > { %vm551_vm3 = vcmp.ne.s32.totalorder %v518_v25, 0  ;;  %vm567_vm9 = vmand %vm459_vm5, %vm549_vm6  ;;  %vm465_vm5 = vcmp.ge.s32.totalorder %v2551_v28, %v2558_v31 }
  0xe3   : > { %vm569_vm4 = vmand %vm461_vm2, %vm551_vm3  ;;  %v1674_v16 = vsel %vm567_vm9, 1.0, %v2245_v30 }
  0xe4   : > { %v516_v2 = vpop.permute.xlu0 %515  ;;  %v1676_v34 = vsel %vm569_vm4, 1.0, %v2245_v30  ;;  %vm466_vm4 = vcmp.ge.s32.totalorder %v2533_v24, %v2542_v27 }
  0xe5   : > { %v520_v29 = vpop.permute.xlu1 %519  ;;  %vm550_vm11 = vcmp.ne.s32.totalorder %v516_v2, 0  ;;  %v423_v2 = vld [vmem:[%s377_s8] sm:$0xff]  ;;  %s1553_s8 = sshll.u32 %s3363_s15, 4  ;;  %s3400_s8 = int_to_ptr.vmem [resolvable:$true] %s1553_s8 }
  0xe6   : > { %vm552_vm10 = vcmp.ne.s32.totalorder %v520_v29, 0  ;;  %vm568_vm13 = vmand %vm460_vm8, %vm550_vm11  ;;  %vm467_vm11 = vcmp.ge.s32.totalorder %v2591_v42, %v2577_v38  ;;  %v424_v29 = vld [vmem:[%s2452_s24] sm:$0xff]  ;;  %s2141_s12 = scalar_lea.vmem %s3400_s8, 2048  ;;  %p2148_p4 = scmp.lt.s32.totalorder %s3400_s8, %s2146_s14 }
  0xe7   : > { %vm570_vm12 = vmand %vm462_vm7, %vm552_vm10  ;;  %v1675_v35 = vsel %vm568_vm13, 1.0, %v2245_v30  ;;  %vm468_vm10 = vcmp.ge.s32.totalorder %v2561_v32, %v2568_v33  ;;  %p2142_p9 = scmp.ne.s32.totalorder %s3400_s8, %s2141_s12  ;;  %p2149_p5 = scmp.lt.s32.totalorder %s2147_s30, %s2141_s12 }
  0xe8   : > { %v1677_v15 = vsel %vm570_vm12, 1.0, %v2245_v30  ;;  %v522_v36 = vpop.permute.xlu0 %521  ;;  %v1977_v37 = vpack.i.bf16 %v1675_v35, %v1674_v16 }
  0xe9   : > { %v1983_v17 = vpack.i.bf16 %v1677_v15, %v1676_v34  ;;  %v524_v21 = vpop.permute.xlu1 %523  ;;  %vm553_vm1 = vcmp.ne.s32.totalorder %v522_v36, 0  ;;  %v425_v36 = vld [vmem:[%s2452_s24 + $0x8] sm:$0xff]  ;;  %p2143_p0 = pnand %p2142_p9, %p3555_p11  ;;  %p2150_p8 = por %p2149_p5, %p2148_p4 }
  0xea   : > { %vm554_vm0 = vcmp.ne.s32.totalorder %v524_v21, 0  ;;  %vm571_vm3 = vmand %vm463_vm15, %vm553_vm1  ;;  %1978 = vperm.xlu0 %1976, %v1977_v37   ;;  %vm469_vm1 = vcmp.ge.s32.totalorder %v2609_v47, %v2599_v44  ;;  %v427_v21 = vld [vmem:[%s2452_s24 + $0x18] sm:$0xff] }
  0xeb   : > { %vm572_vm2 = vmand %vm464_vm14, %vm554_vm0  ;;  %1984 = vperm.xlu1 %1982, %v1983_v17   ;;  %v1678_v22 = vsel %vm571_vm3, 1.0, %v2245_v30  ;;  %vm470_vm0 = vcmp.ge.s32.totalorder %v2594_v43, %v2582_v39  ;;  %p2144_p2 = pneg %p2143_p0 }
  0xec   : > { %v1679_v40 = vsel %vm572_vm2, 1.0, %v2245_v30  ;;  %v526_v23 = vpop.permute.xlu0 %525 }
  0xed   : > { %v528_v41 = vpop.permute.xlu1 %527  ;;  %v1988_v45 = vpack.i.bf16 %v1679_v40, %v1678_v22  ;;  %vm555_vm7 = vcmp.ne.s32.totalorder %v526_v23, 0  ;;  %p2151_p12 = pnand %p2150_p8, %p2144_p2 }
  0xee   : > { %vm556_vm6 = vcmp.ne.s32.totalorder %v528_v41, 0  ;;  %vm573_vm9 = vmand %vm465_vm5, %vm555_vm7  ;;  %vm471_vm7 = vcmp.ge.s32.totalorder %v2633_v53, %v2627_v51 }
  0xef   : > { %vm574_vm8 = vmand %vm466_vm4, %vm556_vm6  ;;  %1989 = vperm.xlu1 %1982, %v1988_v45   ;;  %v1680_v27 = vsel %vm573_vm9, 1.0, %v2245_v30  ;;  %vm472_vm6 = vcmp.ge.s32.totalorder %v2612_v48, %v2617_v49  ;;  %v429_v45 = vld [vmem:[%s2452_s24 + $0x28] sm:$0xff] }
  0xf0   : > { %v1681_v46 = vsel %vm574_vm8, 1.0, %v2245_v30  ;;  %v530_v52 = vpop.permute.xlu0 %529 }
  0xf1   : > { %v532_v50 = vpop.permute.xlu1 %531  ;;  %v1993_v31 = vpack.i.bf16 %v1681_v46, %v1680_v27  ;;  %vm557_vm13 = vcmp.ne.s32.totalorder %v530_v52, 0  ;;  %v426_v46 = vld [vmem:[%s2452_s24 + $0x10] sm:$0xff] }
  0xf2   : > { %vm558_vm12 = vcmp.ne.s32.totalorder %v532_v50, 0  ;;  %vm575_vm15 = vmand %vm467_vm11, %vm557_vm13  ;;  %vm473_vm13 = vcmp.ge.s32.totalorder %v2668_v6, %v2662_v0 }
  0xf3   : > { %vm576_vm14 = vmand %vm468_vm10, %vm558_vm12  ;;  %1994 = vperm.xlu0 %1976, %v1993_v31   ;;  %v1682_v33 = vsel %vm575_vm15, 1.0, %v2245_v30  ;;  %vm474_vm12 = vcmp.ge.s32.totalorder %v2665_v4, %v2657_v63 }
  0xf4   : > { %v1683_v54 = vsel %vm576_vm14, 1.0, %v2245_v30  ;;  %v534_v56 = vpop.permute.xlu0 %533 }
  0xf5   : > { %v536_v55 = vpop.permute.xlu1 %535  ;;  %v1998_v38 = vpack.i.bf16 %v1683_v54, %v1682_v33  ;;  %vm559_vm3 = vcmp.ne.s32.totalorder %v534_v56, 0  ;;  %v431_v33 = vld [vmem:[%s2452_s24 + $0x38] sm:$0xff] }
  0xf6   : > { %vm560_vm2 = vcmp.ne.s32.totalorder %v536_v55, 0  ;;  %vm577_vm5 = vmand %vm469_vm1, %vm559_vm3  ;;  %vm475_vm3 = vcmp.ge.s32.totalorder %v2680_v7, %v2690_v9  ;;  %v428_v55 = vld [vmem:[%s2452_s24 + $0x20] sm:$0xff] }
  0xf7   : > { %vm578_vm4 = vmand %vm470_vm0, %vm560_vm2  ;;  %1999 = vperm.xlu1 %1982, %v1998_v38   ;;  %v1684_v39 = vsel %vm577_vm5, 1.0, %v2245_v30  ;;  %vm476_vm2 = vcmp.ge.s32.totalorder %v2677_v3, %v2685_v8 }
  0xf8   : > { %v1685_v57 = vsel %vm578_vm4, 1.0, %v2245_v30  ;;  %v538_v59 = vpop.permute.xlu0 %537 }
  0xf9   : > { %v540_v58 = vpop.permute.xlu1 %539  ;;  %v2003_v44 = vpack.i.bf16 %v1685_v57, %v1684_v39  ;;  %vm561_vm9 = vcmp.ne.s32.totalorder %v538_v59, 0  ;;  %v433_v59 = vld [vmem:[%s2452_s24 + $0x48] sm:$0xff] }
  0xfa   : > { %vm562_vm8 = vcmp.ne.s32.totalorder %v540_v58, 0  ;;  %vm579_vm11 = vmand %vm471_vm7, %vm561_vm9  ;;  %vm979_vm9 = vcmp.ge.s32.totalorder %v2486_v13, 8 }
  0xfb   : > { %vm580_vm10 = vmand %vm472_vm6, %vm562_vm8  ;;  %2004 = vperm.xlu0 %1976, %v2003_v44   ;;  %v1686_v49 = vsel %vm579_vm11, 1.0, %v2245_v30  ;;  %v430_v44 = vld [vmem:[%s2452_s24 + $0x30] sm:$0xff]  ;;  %vm978_vm8 = vcmp.ge.s32.totalorder %v2472_v5, 8  ;;  %vm996_vm11 = vcmp.lt.s32.totalorder %v2472_v5, 520 }
  0xfc   : > { %v1687_v60 = vsel %vm580_vm10, 1.0, %v2245_v30  ;;  %v542_v62 = vpop.permute.xlu0 %541  ;;  %vm980_vm10 = vcmp.ge.s32.totalorder %v2480_v11, 8 }
  0xfd   : > { %v544_v61 = vpop.permute.xlu1 %543  ;;  %v2008_v51 = vpack.i.bf16 %v1687_v60, %v1686_v49  ;;  %vm563_vm15 = vcmp.ne.s32.totalorder %v542_v62, 0 }
  0xfe   : > { %vm564_vm14 = vcmp.ne.s32.totalorder %v544_v61, 0  ;;  %vm581_vm1 = vmand %vm473_vm13, %vm563_vm15  ;;  %vm981_vm13 = vcmp.ge.s32.totalorder %v2483_v12, 8  ;;  %vm999_vm15 = vcmp.lt.s32.totalorder %v2483_v12, 520 }
  0xff   : > { %vm582_vm0 = vmand %vm474_vm12, %vm564_vm14  ;;  %2009 = vperm.xlu1 %1982, %v2008_v51   ;;  %v1688_v63 = vsel %vm581_vm1, 1.0, %v2245_v30  ;;  %vm997_vm12 = vcmp.lt.s32.totalorder %v2486_v13, 520  ;;  %vm998_vm14 = vcmp.lt.s32.totalorder %v2480_v11, 520 }
 0x100   : > { %v1689_v10 = vsel %vm582_vm0, 1.0, %v2245_v30  ;;  %v546_v0 = vpop.permute.xlu0 %545  ;;  %vm2961_vm0 = vmand %vm978_vm8, %vm996_vm11 }
 0x101   : > { %v548_v14 = vpop.permute.xlu1 %547  ;;  %v2013_v1 = vpack.i.bf16 %v1689_v10, %v1688_v63  ;;  %vm565_vm5 = vcmp.ne.s32.totalorder %v546_v0, 0  ;;  %v435_v10 = vld [vmem:[%s2452_s24 + $0x58] sm:$0xff]  ;;  %v432_v63 = vld [vmem:[%s2452_s24 + $0x40] sm:$0xff]  ;;  %vm2973_vm1 = vmand %vm979_vm9, %vm997_vm12  ;;  %vm3475_vm9 = vcmask 1043456   ;;  %vm985_vm12 = vcmp.ge.s32.totalorder %v2533_v24, 8 }
 0x102   : > { %vm566_vm4 = vcmp.ne.s32.totalorder %v548_v14, 0  ;;  %vm583_vm7 = vmand %vm475_vm3, %vm565_vm5  ;;  %vm1000_vm3 = vcmp.lt.s32.totalorder %v2508_v19, 520  ;;  %vm1001_vm5 = vcmp.lt.s32.totalorder %v2505_v18, 520 }
 0x103   : > { %vm584_vm6 = vmand %vm476_vm2, %vm566_vm4  ;;  %2014 = vperm.xlu0 %1976, %v2013_v1   ;;  %v1690_v25 = vsel %vm583_vm7, 1.0, %v2245_v30  ;;  %vm982_vm2 = vcmp.ge.s32.totalorder %v2508_v19, 8  ;;  %vm983_vm4 = vcmp.ge.s32.totalorder %v2505_v18, 8  ;;  %vm1002_vm7 = vcmp.lt.s32.totalorder %v2551_v28, 520 }
 0x104   : > { %v1691_v20 = vsel %vm584_vm6, 1.0, %v2245_v30  ;;  %vm984_vm6 = vcmp.ge.s32.totalorder %v2551_v28, 8  ;;  %vm3000_vm8 = vmand %vm980_vm10, %vm998_vm14  ;;  %vm1003_vm10 = vcmp.lt.s32.totalorder %v2533_v24, 520  ;;  %vm986_vm14 = vcmp.ge.s32.totalorder %v2591_v42, 8 }
 0x105   : > { %v2018_v8 = vpack.i.bf16 %v1691_v20, %v1690_v25  ;;  %vm3008_vm11 = vmand %vm981_vm13, %vm999_vm15  ;;  %vm1004_vm15 = vcmp.lt.s32.totalorder %v2591_v42, 520 }
 0x106   : > { %vm3025_vm13 = vmand %vm982_vm2, %vm1000_vm3 }
 0x107   : > { %2019 = vperm.xlu1 %1982, %v2018_v8   ;;  %v437_v8 = vld [vmem:[%s2452_s24 + $0x68] sm:$0xff]  ;;  %vm3472_vm2 = vmpackc.low %vm3008_vm11, %vm3000_vm8 }
 0x108   : > { %vm3045_vm3 = vmand %vm983_vm4, %vm1001_vm5  ;;  %vm989_vm5 = vcmp.ge.s32.totalorder %v2594_v43, 8 }
 0x109   : > { %vm3063_vm4 = vmand %vm984_vm6, %vm1002_vm7 }
 0x10a   : > { %vm3474_vm6 = vmpackc.low %vm3045_vm3, %vm3025_vm13 }
 0x10b   : > { %vm1719_vm7 = vmpackc.low %vm2973_vm1, %vm2961_vm0 }
 0x169   : > { %v1979_v26 = vpop.permute.xlu0 %1978 }
 0x16a   : > { %v1985_v9 = vpop.permute.xlu1 %1984  ;;  %v1981_v30 = vunpack.i.h.bf16 %v1979_v26  ;;  %v1980_v34 = vunpack.i.l.bf16 %v1979_v26 }
 0x16b   : > { %v1986_v15 = vunpack.i.l.bf16 %v1985_v9  ;;  %v1987_v40 = vunpack.i.h.bf16 %v1985_v9  ;;  %v434_v9 = vld [vmem:[%s2452_s24 + $0x50] sm:$0xff] }
 0x16c   : > { %v2771_v16 = vmul.f32 %v1981_v30, %v424_v29  ;;  %v2773_v17 = vmul.f32 %v1980_v34, %v423_v2 }
 0x16d   : > { %v2781_v41 = vmul.f32 %v1986_v15, %v425_v36  ;;  %v2789_v31 = vmul.f32 %v1987_v40, %v426_v46  ;;  %v439_v15 = vld [vmem:[%s2452_s24 + $0x78] sm:$0xff] }
 0x16e   : > { %v1990_v35 = vpop.permute.xlu1 %1989  ;;  %731 = vadd.xlane.f32.xlu1 %v2771_v16  ;;  %729 = vadd.xlane.f32.xlu0 %v2773_v17 }
 0x16f   : > { %v1991_v37 = vunpack.i.l.bf16 %v1990_v35  ;;  %v1992_v50 = vunpack.i.h.bf16 %v1990_v35  ;;  %v436_v35 = vld [vmem:[%s2452_s24 + $0x60] sm:$0xff] }
 0x171   : > { %v2779_v22 = vmul.f32 %v1991_v37, %v427_v21  ;;  %v2797_v39 = vmul.f32 %v1992_v50, %v428_v55 }
 0x172   : > { %v1995_v23 = vpop.permute.xlu0 %1994  ;;  %733 = vadd.xlane.f32.xlu0 %v2781_v41 }
 0x173   : > { %v1996_v27 = vunpack.i.l.bf16 %v1995_v23  ;;  %737 = vadd.xlane.f32.xlu1 %v2779_v22  ;;  %v1997_v38 = vunpack.i.h.bf16 %v1995_v23  ;;  %v438_v23 = vld [vmem:[%s2452_s24 + $0x70] sm:$0xff] }
 0x175   : > { %v2787_v52 = vmul.f32 %v1996_v27, %v429_v45  ;;  %v2805_v62 = vmul.f32 %v1997_v38, %v430_v44  ;;  %v440_v27 = vld [vmem:[%s381_s20] sm:$0xff]  ;;  %s3554_s20 = sld [smem:[#allocation14_spill]] }
 0x176   : > { %v2000_v54 = vpop.permute.xlu1 %1999  ;;  %735 = vadd.xlane.f32.xlu0 %v2789_v31 }
 0x177   : > { %v2001_v56 = vunpack.i.l.bf16 %v2000_v54  ;;  %741 = vadd.xlane.f32.xlu1 %v2787_v52  ;;  %v2002_v49 = vunpack.i.h.bf16 %v2000_v54 }
 0x179   : > { %v2795_v57 = vmul.f32 %v2001_v56, %v431_v33  ;;  %v2813_v20 = vmul.f32 %v2002_v49, %v432_v63 }
 0x17a   : > { %v2005_v58 = vpop.permute.xlu0 %2004  ;;  %739 = vadd.xlane.f32.xlu0 %v2797_v39 }
 0x17b   : > { %v2006_v60 = vunpack.i.l.bf16 %v2005_v58  ;;  %745 = vadd.xlane.f32.xlu1 %v2795_v57  ;;  %v2007_v0 = vunpack.i.h.bf16 %v2005_v58  ;;  %s3398_s24 = scalar_lea.hbm %s3554_s20, %s1773_s17 }
 0x17d   : > { %v2803_v61 = vmul.f32 %v2006_v60, %v433_v59  ;;  %v2821_v30 = vmul.f32 %v2007_v0, %v434_v9 }
 0x17e   : > { %v2010_v51 = vpop.permute.xlu1 %2009  ;;  %743 = vadd.xlane.f32.xlu0 %v2805_v62 }
 0x17f   : > { %v2011_v14 = vunpack.i.l.bf16 %v2010_v51  ;;  %749 = vadd.xlane.f32.xlu1 %v2803_v61  ;;  %v2012_v29 = vunpack.i.h.bf16 %v2010_v51 }
 0x181   : > { %v2811_v1 = vmul.f32 %v2011_v14, %v435_v10  ;;  %v2829_v40 = vmul.f32 %v2012_v29, %v436_v35 }
 0x182   : > { %v2015_v25 = vpop.permute.xlu0 %2014  ;;  %747 = vadd.xlane.f32.xlu0 %v2813_v20 }
 0x183   : > { %v2016_v26 = vunpack.i.l.bf16 %v2015_v25  ;;  %753 = vadd.xlane.f32.xlu1 %v2811_v1  ;;  %v2017_v36 = vunpack.i.h.bf16 %v2015_v25 }
 0x185   : > { %v2819_v2 = vmul.f32 %v2016_v26, %v437_v8  ;;  %v2839_v46 = vmul.f32 %v2017_v36, %v438_v23 }
 0x186   : > { %v2020_v34 = vpop.permute.xlu1 %2019  ;;  %751 = vadd.xlane.f32.xlu0 %v2821_v30 }
 0x187   : > { %v2021_v21 = vunpack.i.l.bf16 %v2020_v34  ;;  %757 = vadd.xlane.f32.xlu1 %v2819_v2  ;;  %v2022_v45 = vunpack.i.h.bf16 %v2020_v34 }
 0x189   : > { %v2827_v37 = vmul.f32 %v2021_v21, %v439_v15  ;;  %v2842_v50 = vmul.f32 %v2022_v45, %v440_v27 }
 0x18a   : > { %755 = vadd.xlane.f32.xlu0 %v2829_v40 }
 0x18b   : > { %761 = vadd.xlane.f32.xlu1 %v2827_v37 }
 0x18e   : > { %759 = vadd.xlane.f32.xlu0 %v2839_v46 }
 0x192   : > { %763 = vadd.xlane.f32.xlu0 %v2842_v50 }
 0x1fb   : > { %v732_v54 = vpop.xlane.xlu1 %731  ;;  %v730_v33 = vpop.xlane.xlu0 %729 }
 0x1fc   : > { %v767_v55 = vmul.f32 0.0078125, %v732_v54  ;;  %v766_v56 = vmul.f32 0.0078125, %v730_v33 }
 0x1fe   : > { %v2846_v38 = vsub.f32 %v2771_v16, %v767_v55  ;;  %v2849_v58 = vsub.f32 %v2773_v17, %v766_v56 }
 0x1ff   : > { %v734_v44 = vpop.xlane.xlu0 %733 }
 0x200   : > { %v738_v59 = vpop.xlane.xlu1 %737  ;;  %v768_v49 = vmul.f32 0.0078125, %v734_v44  ;;  %v803_v51 = vmul.f32 %v2846_v38, %v2846_v38  ;;  %v802_v10 = vmul.f32 %v2849_v58, %v2849_v58 }
 0x201   : > { %v770_v60 = vmul.f32 0.0078125, %v738_v59 }
 0x202   : > { %v2856_v63 = vsub.f32 %v2781_v41, %v768_v49  ;;  %822 = vadd.xlane.f32.xlu0 %v803_v51  ;;  %820 = vadd.xlane.f32.xlu1 %v802_v10 }
 0x203   : > { %v2859_v16 = vsub.f32 %v2779_v22, %v770_v60  ;;  %v736_v14 = vpop.xlane.xlu0 %735 }
 0x204   : > { %v742_v17 = vpop.xlane.xlu1 %741  ;;  %v769_v25 = vmul.f32 0.0078125, %v736_v14  ;;  %v804_v8 = vmul.f32 %v2856_v63, %v2856_v63  ;;  %v2024_v14 = vld [vmem:[#allocation5 + $0x40] sm:$0xff]  }
 0x205   : > { %v772_v0 = vmul.f32 0.0078125, %v742_v17  ;;  %v806_v41 = vmul.f32 %v2859_v16, %v2859_v16  ;;  %1774 = vmatprep.subr.bf16.mxu0 %v2024_v14 }
 0x206   : > { %v2864_v9 = vsub.f32 %v2789_v31, %v769_v25  ;;  %824 = vadd.xlane.f32.xlu1 %v804_v8 }
 0x207   : > { %v740_v29 = vpop.xlane.xlu0 %739  ;;  %v2869_v34 = vsub.f32 %v2787_v52, %v772_v0 }
 0x208   : > { %v746_v26 = vpop.xlane.xlu1 %745  ;;  %v771_v15 = vmul.f32 0.0078125, %v740_v29  ;;  %v805_v35 = vmul.f32 %v2864_v9, %v2864_v9 }
 0x209   : > { %v774_v22 = vmul.f32 0.0078125, %v746_v26  ;;  %v808_v52 = vmul.f32 %v2869_v34, %v2869_v34 }
 0x20a   : > { %v2874_v21 = vsub.f32 %v2797_v39, %v771_v15  ;;  %828 = vadd.xlane.f32.xlu1 %v806_v41  ;;  %826 = vadd.xlane.f32.xlu0 %v805_v35  ;;  %v2027_v15 = vld [vmem:[#allocation5 + $0x48] sm:$0xff]  }
 0x20b   : > { %v2877_v31 = vsub.f32 %v2795_v57, %v774_v22  ;;  %v744_v23 = vpop.xlane.xlu0 %743 }
 0x20c   : > { %v750_v36 = vpop.xlane.xlu1 %749  ;;  %v773_v27 = vmul.f32 0.0078125, %v744_v23  ;;  %v807_v54 = vmul.f32 %v2874_v21, %v2874_v21 }
 0x20d   : > { %v776_v45 = vmul.f32 0.0078125, %v750_v36  ;;  %v810_v57 = vmul.f32 %v2877_v31, %v2877_v31 }
 0x20e   : > { %v2884_v33 = vsub.f32 %v2805_v62, %v773_v27  ;;  %832 = vadd.xlane.f32.xlu1 %v808_v52  ;;  %830 = vadd.xlane.f32.xlu0 %v807_v54  ;;  %v2023_v62 = vld [vmem:[#allocation5 + $0x80] sm:$0xff]   ;;  %v2029_v52 = vld [vmem:[#allocation5 + $0x90] sm:$0xff]  }
 0x20f   : > { %v748_v55 = vpop.xlane.xlu0 %747  ;;  %v2889_v56 = vsub.f32 %v2803_v61, %v776_v45  ;;  %1854 = vmatprep.subr.bf16.mxu1 %v2023_v62 }
 0x210   : > { %v754_v39 = vpop.xlane.xlu1 %753  ;;  %v775_v44 = vmul.f32 0.0078125, %v748_v55  ;;  %v809_v60 = vmul.f32 %v2884_v33, %v2884_v33  ;;  %1855 = vmatpush3.bf16.msra.mxu1 %v2023_v62 }
 0x211   : > { %v778_v59 = vmul.f32 0.0078125, %v754_v39  ;;  %v812_v25 = vmul.f32 %v2889_v56, %v2889_v56  ;;  %v2030_v39 = vld [vmem:[#allocation5 + $0x50] sm:$0xff]  }
 0x212   : > { %v2894_v49 = vsub.f32 %v2813_v20, %v775_v44  ;;  %836 = vadd.xlane.f32.xlu1 %v810_v57  ;;  %834 = vadd.xlane.f32.xlu0 %v809_v60  ;;  %v2025_v20 = vld [vmem:[#allocation5] sm:$0xff]   ;;  %v2031_v44 = vld [vmem:[#allocation5 + $0x10] sm:$0xff]   ;;  %v2032_v60 = vld [vmem:[#allocation5 + $0x98] sm:$0xff]  }
 0x213   : > { %v2897_v51 = vsub.f32 %v2811_v1, %v778_v59  ;;  %v752_v17 = vpop.xlane.xlu0 %751  ;;  %v2026_v1 = vld [vmem:[#allocation5 + $0x88] sm:$0xff]   ;;  %1775 = vmatpush3.bf16.msra.mxu0 %v2025_v20  ;;  %v2037_v20 = vld [vmem:[#allocation5 + $0x20] sm:$0xff]  }
 0x214   : > { %v758_v10 = vpop.xlane.xlu1 %757  ;;  %v777_v61 = vmul.f32 0.0078125, %v752_v17  ;;  %v811_v8 = vmul.f32 %v2894_v49, %v2894_v49  ;;  %1856 = vmatprep.subr.bf16.mxu1 %v2026_v1  ;;  %1776 = vmatprep.subr.bf16.mxu0 %v2027_v15  ;;  %v2043_v15 = vld [vmem:[#allocation5 + $0x30] sm:$0xff]  }
 0x215   : > { %v780_v0 = vmul.f32 0.0078125, %v758_v10  ;;  %v814_v22 = vmul.f32 %v2897_v51, %v2897_v51  ;;  %1857 = vmatpush3.bf16.msra.mxu1 %v2026_v1  ;;  %v2038_v1 = vld [vmem:[#allocation5 + $0xa8] sm:$0xff]  }
 0x216   : > { %v2904_v26 = vsub.f32 %v2821_v30, %v777_v61  ;;  %840 = vadd.xlane.f32.xlu1 %v812_v25  ;;  %838 = vadd.xlane.f32.xlu0 %v811_v8  ;;  %v2028_v30 = vld [vmem:[#allocation5 + $0x8] sm:$0xff]   ;;  %v2035_v61 = vld [vmem:[#allocation5 + $0xa0] sm:$0xff]  }
 0x217   : > { %v756_v41 = vpop.xlane.xlu0 %755  ;;  %v2909_v35 = vsub.f32 %v2819_v2, %v780_v0  ;;  %1777 = vmatpush3.bf16.msra.mxu0 %v2028_v30  ;;  %1858 = vmatprep.subr.bf16.mxu1 %v2029_v52  ;;  %v2034_v0 = vld [vmem:[#allocation5 + $0x18] sm:$0xff]   ;;  %v2036_v25 = vld [vmem:[#allocation5 + $0x60] sm:$0xff]  }
 0x218   : > { %v762_v29 = vpop.xlane.xlu1 %761  ;;  %v779_v23 = vmul.f32 0.0078125, %v756_v41  ;;  %v813_v45 = vmul.f32 %v2904_v26, %v2904_v26  ;;  %1778 = vmatprep.subr.bf16.mxu0 %v2030_v39  ;;  %v2040_v41 = vld [vmem:[#allocation5 + $0x28] sm:$0xff]  }
 0x219   : > { %v782_v36 = vmul.f32 0.0078125, %v762_v29  ;;  %v816_v57 = vmul.f32 %v2909_v35, %v2909_v35  ;;  %1859 = vmatpush3.bf16.msra.mxu1 %v2029_v52  ;;  %v2039_v29 = vld [vmem:[#allocation5 + $0x68] sm:$0xff]  }
 0x21a   : > { %v2914_v27 = vsub.f32 %v2829_v40, %v779_v23  ;;  %844 = vadd.xlane.f32.xlu1 %v814_v22  ;;  %842 = vadd.xlane.f32.xlu0 %v813_v45  ;;  %v2042_v22 = vld [vmem:[#allocation5 + $0x70] sm:$0xff]   ;;  %v2045_v23 = vld [vmem:[#allocation5 + $0x78] sm:$0xff]  }
 0x21b   : > { %v760_v54 = vpop.xlane.xlu0 %759  ;;  %v2917_v2 = vsub.f32 %v2827_v37, %v782_v36  ;;  %1779 = vmatpush3.bf16.msra.mxu0 %v2031_v44  ;;  %v2033_v37 = vld [vmem:[#allocation5 + $0x58] sm:$0xff]   ;;  %1860 = vmatprep.subr.bf16.mxu1 %v2032_v60 }
 0x21c   : > { %v781_v55 = vmul.f32 0.0078125, %v760_v54  ;;  %v815_v59 = vmul.f32 %v2914_v27, %v2914_v27  ;;  %1780 = vmatprep.subr.bf16.mxu0 %v2033_v37  ;;  %v2044_v36 = vld [vmem:[#allocation5 + $0xb8] sm:$0xff]  }
 0x21d   : > { %v818_v17 = vmul.f32 %v2917_v2, %v2917_v2  ;;  %1861 = vmatpush3.bf16.msra.mxu1 %v2032_v60  ;;  %v2046_v45 = vld [vmem:[#allocation5 + $0x38] sm:$0xff]  }
 0x21e   : > { %v2924_v40 = vsub.f32 %v2839_v46, %v781_v55  ;;  %848 = vadd.xlane.f32.xlu1 %v816_v57  ;;  %846 = vadd.xlane.f32.xlu0 %v815_v59 }
 0x21f   : > { %v764_v62 = vpop.xlane.xlu0 %763  ;;  %1781 = vmatpush3.bf16.msra.mxu0 %v2034_v0  ;;  %1862 = vmatprep.subr.bf16.mxu1 %v2035_v61 }
 0x220   : > { %v783_v10 = vmul.f32 0.0078125, %v764_v62  ;;  %v817_v14 = vmul.f32 %v2924_v40, %v2924_v40  ;;  %1782 = vmatprep.subr.bf16.mxu0 %v2036_v25 }
 0x221   : > { %1863 = vmatpush3.bf16.msra.mxu1 %v2035_v61 }
 0x222   : > { %v2931_v46 = vsub.f32 %v2842_v50, %v783_v10  ;;  %852 = vadd.xlane.f32.xlu1 %v818_v17  ;;  %850 = vadd.xlane.f32.xlu0 %v817_v14  ;;  %v2041_v50 = vld [vmem:[#allocation5 + $0xb0] sm:$0xff]  }
 0x223   : > { %1783 = vmatpush3.bf16.msra.mxu0 %v2037_v20  ;;  %1864 = vmatprep.subr.bf16.mxu1 %v2038_v1 }
 0x224   : > { %v819_v8 = vmul.f32 %v2931_v46, %v2931_v46  ;;  %1784 = vmatprep.subr.bf16.mxu0 %v2039_v29 }
 0x225   : > { %1865 = vmatpush3.bf16.msra.mxu1 %v2038_v1  ;;  %v2938_v1 = vld [vmem:[%s3460_s4] ss:$0 sm:$0xff] }
 0x226   : > { %854 = vadd.xlane.f32.xlu0 %v819_v8  ;;  %1866 = vmatprep.subr.bf16.mxu1 %v2041_v50 }
 0x227   : > { %1785 = vmatpush3.bf16.msra.mxu0 %v2040_v41 }
 0x228   : > { %1786 = vmatprep.subr.bf16.mxu0 %v2042_v22 }
 0x229   : > { %1867 = vmatpush3.bf16.msra.mxu1 %v2041_v50 }
 0x22a   : > { %1868 = vmatprep.subr.bf16.mxu1 %v2044_v36 }
 0x22b   : > { %1787 = vmatpush3.bf16.msra.mxu0 %v2043_v15 }
 0x22c   : > { %1788 = vmatprep.subr.bf16.mxu0 %v2045_v23 }
 0x22d   : > { %1869 = vmatpush3.bf16.msra.mxu1 %v2044_v36 }
 0x22f   : > { %1789 = vmatpush3.bf16.msra.mxu0 %v2046_v45 }
 0x28f   : > { %v821_v30 = vpop.xlane.xlu1 %820  ;;  %v823_v52 = vpop.xlane.xlu0 %822 }
 0x290   : > { %v856_v54 = vmul.f32 0.0078125, %v821_v30  ;;  %v857_v39 = vmul.f32 0.0078125, %v823_v52  ;;  %v2949_v52 = vld [vmem:[%s3461_s5] ss:$0 sm:$0xff] }
 0x292   : > { %v874_v55 = vadd.f32 1e-05, %v856_v54  ;;  %v875_v57 = vadd.f32 1e-05, %v857_v39 }
 0x293   : > { %v825_v59 = vpop.xlane.xlu1 %824 }
 0x294   : > { %2047 = vrsqrt.f32 %v874_v55  ;;  %v858_v44 = vmul.f32 0.0078125, %v825_v59 }
 0x295   : > { %2049 = vrsqrt.f32 %v875_v57 }
 0x296   : > { %v876_v60 = vadd.f32 1e-05, %v858_v44 }
 0x297   : > { %v829_v62 = vpop.xlane.xlu1 %828  ;;  %v827_v37 = vpop.xlane.xlu0 %826 }
 0x298   : > { %2051 = vrsqrt.f32 %v876_v60  ;;  %v860_v10 = vmul.f32 0.0078125, %v829_v62  ;;  %v859_v17 = vmul.f32 0.0078125, %v827_v37 }
 0x29a   : > { %v878_v14 = vadd.f32 1e-05, %v860_v10  ;;  %v877_v0 = vadd.f32 1e-05, %v859_v17 }
 0x29b   : > { %v833_v61 = vpop.xlane.xlu1 %832  ;;  %v831_v25 = vpop.xlane.xlu0 %830 }
 0x29c   : > { %2053 = vrsqrt.f32 %v878_v14  ;;  %v862_v8 = vmul.f32 0.0078125, %v833_v61  ;;  %v861_v20 = vmul.f32 0.0078125, %v831_v25 }
 0x29d   : > { %2055 = vrsqrt.f32 %v877_v0 }
 0x29e   : > { %v2048_v29 = vpop.eup %2047  ;;  %v880_v41 = vadd.f32 1e-05, %v862_v8  ;;  %v879_v50 = vadd.f32 1e-05, %v861_v20 }
 0x29f   : > { %v2050_v22 = vpop.eup %2049  ;;  %v837_v15 = vpop.xlane.xlu1 %836  ;;  %v910_v23 = vmul.f32 %v2048_v29, %v2849_v58 }
 0x2a0   : > { %v835_v36 = vpop.xlane.xlu0 %834  ;;  %2057 = vrsqrt.f32 %v880_v41  ;;  %v864_v45 = vmul.f32 0.0078125, %v837_v15  ;;  %v911_v54 = vmul.f32 %v2050_v22, %v2846_v38 }
 0x2a1   : > { %v863_v30 = vmul.f32 0.0078125, %v835_v36  ;;  %2059 = vrsqrt.f32 %v879_v50  ;;  %v935_v58 = vmul.f32 %v2938_v1, %v910_v23 }
 0x2a2   : > { %v2052_v39 = vpop.eup %2051  ;;  %v882_v55 = vadd.f32 1e-05, %v864_v45  ;;  %v936_v59 = vmul.f32 %v2938_v1, %v911_v54 }
 0x2a3   : > { %v881_v57 = vadd.f32 1e-05, %v863_v30  ;;  %v841_v44 = vpop.xlane.xlu1 %840  ;;  %v912_v62 = vmul.f32 %v2052_v39, %v2856_v63  ;;  %v2967_v37 = vadd.f32 %v2949_v52, %v935_v58 }
 0x2a4   : > { %v839_v60 = vpop.xlane.xlu0 %838  ;;  %2061 = vrsqrt.f32 %v882_v55  ;;  %v866_v5 = vmul.f32 0.0078125, %v841_v44  ;;  %v2980_v63 = vadd.f32 %v2949_v52, %v936_v59 }
 0x2a5   : > { %v865_v17 = vmul.f32 0.0078125, %v839_v60  ;;  %2063 = vrsqrt.f32 %v881_v57  ;;  %v937_v14 = vmul.f32 %v2938_v1, %v912_v62  ;;  %v1068_v25 = vsel %vm2961_vm0, %v2967_v37, 0.0 }
 0x2a6   : > { %v2054_v13 = vpop.eup %2053  ;;  %v884_v0 = vadd.f32 1e-05, %v866_v5  ;;  %v1069_v8 = vsel %vm2973_vm1, %v2980_v63, 0.0  ;;  %v1720_v62 = vpack.c.bf16 %v2980_v63, %v2967_v37  ;;  %vm3514_vm0 = vcmp.lt.s32.totalorder %v2561_v32, 520 }
 0x2a7   : > { %v883_v61 = vadd.f32 1e-05, %v865_v17  ;;  %v2056_v20 = vpop.eup %2055  ;;  %v845_v29 = vpop.xlane.xlu1 %844  ;;  %v962_v50 = vadd.f32 %v2949_v52, %v937_v14  ;;  %v914_v22 = vmul.f32 %v2054_v13, %v2859_v16  ;;  %v3012_v30 = vpack.c.bf16 %v1069_v8, %v1068_v25 }
 0x2a8   : > { %v843_v41 = vpop.xlane.xlu0 %842  ;;  %2065 = vrsqrt.f32 %v884_v0  ;;  %v868_v15 = vmul.f32 0.0078125, %v845_v29  ;;  %v913_v23 = vmul.f32 %v2056_v20, %v2864_v9  ;;  %vm3515_vm1 = vcmp.ge.s32.totalorder %v2561_v32, 8 }
 0x2a9   : > { %v867_v36 = vmul.f32 0.0078125, %v843_v41  ;;  %2067 = vrsqrt.f32 %v883_v61  ;;  %v939_v9 = vmul.f32 %v2938_v1, %v914_v22  ;;  %v1070_v59 = vsel %vm3000_vm8, %v962_v50, 0.0 }
 0x2aa   : > { %v2058_v11 = vpop.eup %2057  ;;  %v886_v54 = vadd.f32 1e-05, %v868_v15  ;;  %v938_v39 = vmul.f32 %v2938_v1, %v913_v23  ;;  %v1105_v19 = vrot.slane %v3012_v30, 4 }
 0x2ab   : > { %v885_v58 = vadd.f32 1e-05, %v867_v36  ;;  %v2060_v55 = vpop.eup %2059  ;;  %v849_v57 = vpop.xlane.xlu1 %848  ;;  %v964_v44 = vadd.f32 %v2949_v52, %v939_v9  ;;  %v916_v5 = vmul.f32 %v2058_v11, %v2869_v34 }
 0x2ac   : > { %v847_v12 = vpop.xlane.xlu0 %846  ;;  %2069 = vrsqrt.f32 %v886_v54  ;;  %v870_v17 = vmul.f32 0.0078125, %v849_v57  ;;  %v963_v13 = vadd.f32 %v2949_v52, %v938_v39  ;;  %v915_v37 = vmul.f32 %v2060_v55, %v2874_v21 }
 0x2ad   : > { %v869_v14 = vmul.f32 0.0078125, %v847_v12  ;;  %2071 = vrsqrt.f32 %v885_v58  ;;  %v941_v63 = vmul.f32 %v2938_v1, %v916_v5  ;;  %v1072_v15 = vsel %vm3025_vm13, %v964_v44, 0.0 }
 0x2ae   : > { %v2062_v0 = vpop.eup %2061  ;;  %v888_v61 = vadd.f32 1e-05, %v870_v17  ;;  %v1071_v21 = vsel %vm3008_vm11, %v963_v13, 0.0  ;;  %v3054_v8 = vpack.c.bf16 %v963_v13, %v962_v50  ;;  %v940_v22 = vmul.f32 %v2938_v1, %v915_v37 }
 0x2af   : > { %v887_v25 = vadd.f32 1e-05, %v869_v14  ;;  %v2064_v20 = vpop.eup %2063  ;;  %v853_v18 = vpop.xlane.xlu1 %852  ;;  %v1087_v29 = vpack.c.bf16 %v1071_v21, %v1070_v59  ;;  %v918_v50 = vmul.f32 %v2062_v0, %v2877_v31  ;;  %v966_v11 = vadd.f32 %v2949_v52, %v941_v63 }
 0x2b0   : > { %v851_v41 = vpop.xlane.xlu0 %850  ;;  %2073 = vrsqrt.f32 %v888_v61  ;;  %v872_v23 = vmul.f32 0.0078125, %v853_v18  ;;  %1870 = vmatprep.mubr.msk.bf16.mxu1 %vm3472_vm2, %v3054_v8  ;;  %v917_v28 = vmul.f32 %v2064_v20, %v2884_v33  ;;  %v965_v9 = vadd.f32 %v2949_v52, %v940_v22  ;;  %vm3091_vm2 = vmand %vm985_vm12, %vm1003_vm10 }
 0x2b1   : > { %v871_v30 = vmul.f32 0.0078125, %v851_v41  ;;  %2075 = vrsqrt.f32 %v887_v25  ;;  %v1106_v31 = vrot.slane %v1087_v29, 4  ;;  %v943_v57 = vmul.f32 %v2938_v1, %v918_v50  ;;  %vm3473_vm12 = vmpackc.low %vm3091_vm2, %vm3063_vm4 }
 0x2b2   : > { %v2066_v54 = vpop.eup %2065  ;;  %v890_v58 = vadd.f32 1e-05, %v872_v23  ;;  %v942_v55 = vmul.f32 %v2938_v1, %v917_v28  ;;  %v1073_v5 = vsel %vm3045_vm3, %v965_v9, 0.0  ;;  %v3099_v17 = vpack.c.bf16 %v965_v9, %v964_v44 }
 0x2b3   : > { %v889_v39 = vadd.f32 1e-05, %v871_v30  ;;  %v2068_v12 = vpop.eup %2067  ;;  %v1107_v59 = vsel %vm3475_vm9, %v1105_v19, %v1106_v31  ;;  %v920_v13 = vmul.f32 %v2066_v54, %v2889_v56  ;;  %v1088_v24 = vpack.c.bf16 %v1073_v5, %v1072_v15 }
 0x2b4   : > { %v855_v14 = vpop.xlane.xlu0 %854  ;;  %2077 = vrsqrt.f32 %v890_v58  ;;  %1361 = vmatprep.mubr.bf16.mxu0 %v1107_v59  ;;  %v967_v63 = vadd.f32 %v2949_v52, %v942_v55  ;;  %1871 = vmatmul.mubr.msk.bf16.vlgmr.msra.gmra.mrb[0].mxu1 %vm3474_vm6, %v3099_v17  ;;  %v1074_v56 = vsel %vm3063_vm4, %v966_v11, 0.0  ;;  %v919_v44 = vmul.f32 %v2068_v12, %v2894_v49 }
 0x2b5   : > { %v873_v37 = vmul.f32 0.0078125, %v855_v14  ;;  %2079 = vrsqrt.f32 %v889_v39  ;;  %1721 = vmatmul.mubr.msk.bf16.vlgmr.msra.gmra.mrb[0].mxu0 %vm1719_vm7, %v1720_v62  ;;  %vm1007_vm10 = vcmp.lt.s32.totalorder %v2594_v43, 520  ;;  %v1108_v61 = vrot.slane %v1088_v24, 4  ;;  %vm3130_vm7 = vmand %vm3515_vm1, %vm3514_vm0 }
 0x2b6   : > { %v2070_v19 = vpop.eup %2069  ;;  %v1075_v38 = vsel %vm3091_vm2, %v967_v63, 0.0  ;;  %v3124_v10 = vpack.c.bf16 %v967_v63, %v966_v11  ;;  %v944_v21 = vmul.f32 %v2938_v1, %v919_v44  ;;  %v968_v20 = vadd.f32 %v2949_v52, %v943_v57  ;;  %vm3150_vm0 = vmand %vm986_vm14, %vm1004_vm15 }
 0x2b7   : > { %v891_v0 = vadd.f32 1e-05, %v873_v37  ;;  %v2072_v25 = vpop.eup %2071  ;;  %v3134_v49 = vpack.c.bf16 %v1075_v38, %v1074_v56  ;;  %v945_v18 = vmul.f32 %v2938_v1, %v920_v13  ;;  %v1109_v29 = vsel %vm3475_vm9, %v1106_v31, %v1108_v61  ;;  %vm3476_vm1 = vmpackc.low %vm3130_vm7, %vm3150_vm0 }
 0x2b8   : > { %1874 = vmatprep.mubr.msk.bf16.mxu1 %vm3473_vm12, %v3124_v10  ;;  %v921_v41 = vmul.f32 %v2072_v25, %v2904_v26  ;;  %v922_v22 = vmul.f32 %v2070_v19, %v2897_v51  ;;  %1369 = vmatprep.mubr.bf16.mxu0 %v1109_v29  ;;  %v969_v15 = vadd.f32 %v2949_v52, %v944_v21  ;;  %vm988_vm12 = vcmp.ge.s32.totalorder %v2609_v47, 8  ;;  %vm3169_vm15 = vmand %vm989_vm5, %vm1007_vm10 }
 0x2b9   : > { %2081 = vrsqrt.f32 %v891_v0  ;;  %v1110_v50 = vrot.slane %v3134_v49, 4  ;;  %vm1006_vm14 = vcmp.lt.s32.totalorder %v2609_v47, 520  ;;  %v3520_v51 = vmov 0 }
 0x2ba   : > { %v2074_v42 = vpop.eup %2073  ;;  %v946_v23 = vmul.f32 %v2938_v1, %v921_v41  ;;  %v3521_v51 = vsel %vm3169_vm15, 4294967295, %v3520_v51  ;;  %v1076_v30 = vsel %vm3150_vm0, %v968_v20, 0.0  ;;  %v1077_v47 = vsel %vm3130_vm7, %v969_v15, 0.0  ;;  %vm3183_vm5 = vmand %vm988_vm12, %vm1006_vm14 }
 0x2bb   : > { %v2076_v26 = vpop.eup %2075  ;;  %v3179_v28 = vpack.c.bf16 %v969_v15, %v968_v20  ;;  %v970_v31 = vadd.f32 %v2949_v52, %v945_v18  ;;  %v3522_v9 = vmov 0  ;;  %v947_v54 = vmul.f32 %v2938_v1, %v922_v22  ;;  %vm3524_vm12 = vmpackc.low %vm3008_vm11, %vm3000_vm8 }
 0x2bc   : > { %v971_v43 = vadd.f32 %v2949_v52, %v946_v23  ;;  %v3523_v9 = vsel %vm3183_vm5, 4294967295, %v3522_v9  ;;  %v923_v11 = vmul.f32 %v2076_v26, %v2914_v27  ;;  %v924_v58 = vmul.f32 %v2074_v42, %v2909_v35  ;;  %vm3477_vm14 = vmpackc.low %vm3169_vm15, %vm3183_vm5  ;;  %v3357_v26 = vld [vmem:[%s3463_s7] ss:$0 sm:$0xff] }
 0x2bd   : > { %v3190_v39 = vpack.c.bf16 %v1077_v47, %v1076_v30  ;;  %1875 = vmatmul.mubr.msk.bf16.gmra.mrb[4].mxu1 %vm3476_vm1, %v3179_v28  ;;  %1724 = vmatmul.mubr.msk.bf16.gmra.mrb[4].mxu0 %vm3524_vm12, %v3054_v8  ;;  %vm3525_vm10 = vcmask 1043456   ;;  %vm990_vm6 = vcmp.ge.s32.totalorder %v2633_v53, 8  ;;  %vm1008_vm9 = vcmp.lt.s32.totalorder %v2633_v53, 520 }
 0x2be   : > { %v1111_v27 = vsel %vm3525_vm10, %v1108_v61, %v1110_v50  ;;  %v2078_v35 = vpop.eup %2077  ;;  %v3211_v55 = vpack.c.bf16 %v971_v43, %v970_v31  ;;  %v948_v16 = vmul.f32 %v2938_v1, %v923_v11  ;;  %vm3526_vm8 = vcmp.lt.s32.totalorder %v2612_v48, 520 }
 0x2bf   : > { %1377 = vmatprep.mubr.bf16.mxu0 %v1111_v27  ;;  %vm3527_vm11 = vcmp.ge.s32.totalorder %v2612_v48, 8  ;;  %v2080_v8 = vpop.eup %2079  ;;  %vm1011_vm1 = vcmp.lt.s32.totalorder %v2665_v4, 520  ;;  %v926_v53 = vmul.f32 %v2078_v35, %v2917_v2  ;;  %v972_v48 = vadd.f32 %v2949_v52, %v947_v54 }
 0x2c0   : > { %vm3218_vm12 = vmand %vm3527_vm11, %vm3526_vm8  ;;  %1878 = vmatprep.mubr.msk.bf16.mxu1 %vm3477_vm14, %v3211_v55  ;;  %v973_v57 = vadd.f32 %v2949_v52, %v948_v16  ;;  %v925_v59 = vmul.f32 %v2080_v8, %v2924_v40  ;;  %v949_v5 = vmul.f32 %v2938_v1, %v924_v58  ;;  %v1112_v2 = vrot.slane %v3190_v39, 4 }
 0x2c1   : > { %vm3233_vm8 = vmand %vm990_vm6, %vm1008_vm9  ;;  %vm992_vm14 = vcmp.ge.s32.totalorder %v2668_v6, 8  ;;  %vm1010_vm10 = vcmp.lt.s32.totalorder %v2668_v6, 520  ;;  %v1079_v13 = vsel %vm3169_vm15, %v971_v43, 0.0  ;;  %vm3532_vm9 = vcmp.ge.s32.totalorder %v2665_v4, 8 }
 0x2c2   : > { %v1738_v24 = vpack.c.bf16 %v973_v57, %v972_v48  ;;  %v950_v40 = vmul.f32 %v2938_v1, %v925_v59  ;;  %vm3253_vm6 = vmand %vm3532_vm9, %vm1011_vm1  ;;  %v951_v56 = vmul.f32 %v2938_v1, %v926_v53  ;;  %v1078_v6 = vsel %vm3183_vm5, %v970_v31, 0.0 }
 0x2c3   : > { %v2082_v14 = vpop.eup %2081  ;;  %v974_v44 = vadd.f32 %v2949_v52, %v949_v5  ;;  %vm3264_vm15 = vmand %vm992_vm14, %vm1010_vm10  ;;  %vm1013_vm1 = vcmp.lt.s32.totalorder %v2677_v3, 520  ;;  %v1091_v4 = vpack.c.bf16 %v1079_v13, %v1078_v6  ;;  %vm3539_vm14 = vcmask 1043456  }
 0x2c4   : > { %v927_v63 = vmul.f32 %v2082_v14, %v2931_v46  ;;  %v975_v19 = vadd.f32 %v2949_v52, %v950_v40  ;;  %vm3537_vm9 = vmpackc.low %vm3218_vm12, %vm3233_vm8  ;;  %v1113_v46 = vsel %vm3539_vm14, %v1110_v50, %v1112_v2  ;;  %vm1012_vm5 = vcmp.lt.s32.totalorder %v2680_v7, 520 }
 0x2c5   : > { %1879 = vmatmul.mubr.msk.bf16.gmra.mrb[8].mxu1 %vm3537_vm9, %v1738_v24  ;;  %vm3538_vm11 = vmpackc.low %vm3045_vm3, %vm3025_vm13  ;;  %vm994_vm9 = vcmp.ge.s32.totalorder %v2680_v7, 8  ;;  %v976_v34 = vadd.f32 %v2949_v52, %v951_v56  ;;  %vm3540_vm13 = vcmp.ge.s32.totalorder %v2677_v3, 8  ;;  %v1114_v25 = vrot.slane %v1091_v4, 4 }
 0x2c6   : > { %1727 = vmatmul.mubr.msk.bf16.gmra.mrb[8].mxu0 %vm3538_vm11, %v3099_v17  ;;  %vm1740_vm10 = vmpackc.low %vm3253_vm6, %vm3264_vm15  ;;  %v952_v61 = vmul.f32 %v2938_v1, %v927_v63  ;;  %v1741_v38 = vpack.c.bf16 %v975_v19, %v974_v44  ;;  %v1080_v3 = vsel %vm3233_vm8, %v972_v48, 0.0  ;;  %v1083_v18 = vsel %vm3253_vm6, %v975_v19, 0.0 }
 0x2c7   : > { %1385 = vmatprep.mubr.bf16.mxu0 %v1113_v46  ;;  %vm3292_vm3 = vmand %vm3540_vm13, %vm1013_vm1  ;;  %v1115_v21 = vsel %vm3539_vm14, %v1112_v2, %v1114_v25  ;;  %v1082_v29 = vsel %vm3264_vm15, %v974_v44, 0.0  ;;  %vm3549_vm13 = vnez %v3523_v9 }
 0x2c8   : > { %v977_v60 = vadd.f32 %v2949_v52, %v952_v61  ;;  %1882 = vmatprep.mubr.msk.bf16.mxu1 %vm1740_vm10, %v1741_v38  ;;  %vm3301_vm11 = vmand %vm994_vm9, %vm1012_vm5  ;;  %v1081_v52 = vsel %vm3218_vm12, %v973_v57, 0.0  ;;  %v1093_v41 = vpack.c.bf16 %v1083_v18, %v1082_v29 }
 0x2c9   : > { %vm1764_vm1 = vmpackc.low %vm3292_vm3, %vm3301_vm11  ;;  %v1092_v49 = vpack.c.bf16 %v1081_v52, %v1080_v3  ;;  %v1084_v22 = vsel %vm3301_vm11, %v976_v34, 0.0 }
 0x2ca   : > { %v1765_v7 = vpack.c.bf16 %v977_v60, %v976_v34  ;;  %vm3545_vm5 = vmpackc.low %vm3091_vm2, %vm3063_vm4  ;;  %v1118_v33 = vrot.slane %v1093_v41, 4  ;;  %vm3548_vm4 = vnez %v3521_v51 }
 0x2cb   : > { %v1116_v20 = vrot.slane %v1092_v49, 4  ;;  %vm3546_vm9 = vmpackc.low %vm3130_vm7, %vm3150_vm0 }
 0x2cc   : > { %vm3547_vm2 = vmmov %vm3539_vm14 }
 0x2cd   : > { %1883 = vmatmul.mubr.msk.bf16.gmra.mrb[12].mxu1 %vm1764_vm1, %v1765_v7  ;;  %v1117_v36 = vsel %vm3547_vm2, %v1114_v25, %v1116_v20  ;;  %vm3550_vm7 = vmpackc.low %vm3548_vm4, %vm3549_vm13 }
 0x2ce   : > { %1730 = vmatmul.mubr.msk.bf16.gmra.mrb[12].mxu0 %vm3545_vm5, %v3124_v10  ;;  %v1085_v10 = vsel %vm3292_vm3, %v977_v60, 0.0  ;;  %vm3551_vm0 = vmmov %vm3547_vm2 }
 0x2cf   : > { %1393 = vmatprep.mubr.bf16.mxu0 %v1115_v21  ;;  %v1094_v15 = vpack.c.bf16 %v1085_v10, %v1084_v22  ;;  %v1119_v62 = vsel %vm3551_vm0, %v1116_v20, %v1118_v33  ;;  %vm3552_vm3 = vmpackc.low %vm3218_vm12, %vm3233_vm8 }
 0x2d0   : > { %vm3553_vm11 = vmmov %vm3551_vm0 }
 0x2d1   : > { %v1120_v32 = vrot.slane %v1094_v15, 4 }
 0x2d3   : > { %v1121_v50 = vsel %vm3553_vm11, %v1118_v33, %v1120_v32 }
 0x2d6   : > { %1733 = vmatmul.mubr.msk.bf16.gmra.mrb[16].mxu0 %vm3546_vm9, %v3179_v28 }
 0x2d7   : > { %1401 = vmatprep.mubr.bf16.mxu0 %v1117_v36 }
 0x2de   : > { %1736 = vmatmul.mubr.msk.bf16.gmra.mrb[20].mxu0 %vm3550_vm7, %v3211_v55 }
 0x2df   : > { %1409 = vmatprep.mubr.bf16.mxu0 %v1119_v62 }
 0x2e6   : > { %1739 = vmatmul.mubr.msk.bf16.gmra.mrb[24].mxu0 %vm3552_vm3, %v1738_v24 }
 0x2e7   : > { %1417 = vmatprep.mubr.bf16.mxu0 %v1121_v50 }
 0x2ee   : > { %1742 = vmatmul.mubr.msk.bf16.gmra.mrb[28].mxu0 %vm1740_vm10, %v1741_v38 }
 0x387   : > { %v1872_v42 = vpop.f32.mrb[0].mxu1 }
 0x388   : > { %v1790_v23 = vpop.f32.mrb[0].mxu0  ;;  %v1460_v51 = vpop.f32.mrb[1].mxu1 }
 0x389   : > { %v1791_v30 = vpop.f32.mrb[1].mxu0  ;;  %v1873_v28 = vpop.f32.mrb[2].mxu1 }
 0x38a   : > { %v1792_v47 = vadd.f32 %v1791_v30, %v1790_v23  ;;  %v1793_v31 = vpop.f32.mrb[2].mxu0  ;;  %v1463_v43 = vpop.f32.mrb[3].mxu1 }
 0x38b   : > { %v1794_v9 = vpop.f32.mrb[3].mxu0 }
 0x38c   : > { %v1364_v11 = vadd.f32 %v1792_v47, %v3357_v26  ;;  %v1795_v54 = vadd.f32 %v1794_v9, %v1793_v31 }
 0x38e   : > { %v1461_v58 = vadd.f32 %v1460_v51, %v1364_v11  ;;  %v1367_v39 = vadd.f32 %v1795_v54, %v3357_v26 }
 0x390   : > { %1523 = vst [vmem:[%s3363_s15] sm:$0xff] %v1461_v58  ;;  %v1464_v27 = vadd.f32 %v1463_v43, %v1367_v39  ;;  %v1876_v35 = vpop.f32.mrb[4].mxu1  ;;  %v1796_v55 = vpop.f32.mrb[4].mxu0 }
 0x391   : > { %v1476_v16 = vpop.f32.mrb[5].mxu1  ;;  %v1797_v45 = vpop.f32.mrb[5].mxu0 }
 0x392   : > { %1524 = vst [vmem:[%s3363_s15 + $0x8] sm:$0xff] %v1464_v27  ;;  %v1798_v8 = vadd.f32 %v1797_v45, %v1796_v55  ;;  %v1877_v53 = vpop.f32.mrb[6].mxu1  ;;  %v1799_v48 = vpop.f32.mrb[6].mxu0 }
 0x393   : > { %v1479_v57 = vpop.f32.mrb[7].mxu1  ;;  %v1800_v12 = vpop.f32.mrb[7].mxu0 }
 0x394   : > { %v1372_v59 = vadd.f32 %v1798_v8, %v3357_v26  ;;  %v1801_v5 = vadd.f32 %v1800_v12, %v1799_v48 }
 0x396   : > { %v1469_v2 = vadd.f32 %v1872_v42, %v1372_v59  ;;  %v1375_v14 = vadd.f32 %v1801_v5, %v3357_v26 }
 0x398   : > { %1525 = vst [vmem:[%s3363_s15 + $0x10] sm:$0xff] %v1469_v2  ;;  %v1472_v13 = vadd.f32 %v1873_v28, %v1375_v14  ;;  %v1880_v24 = vpop.f32.mrb[8].mxu1 }
 0x399   : > { %v1802_v40 = vpop.f32.mrb[8].mxu0  ;;  %v1492_v37 = vpop.f32.mrb[9].mxu1 }
 0x39a   : > { %v1803_v63 = vpop.f32.mrb[9].mxu0  ;;  %1526 = vst [vmem:[%s3363_s15 + $0x18] sm:$0xff] %v1472_v13  ;;  %v1881_v6 = vpop.f32.mrb[10].mxu1 }
 0x39b   : > { %v1804_v56 = vadd.f32 %v1803_v63, %v1802_v40  ;;  %v1805_v44 = vpop.f32.mrb[10].mxu0  ;;  %v1495_v19 = vpop.f32.mrb[11].mxu1 }
 0x39c   : > { %v1806_v0 = vpop.f32.mrb[11].mxu0 }
 0x39d   : > { %v1380_v4 = vadd.f32 %v1804_v56, %v3357_v26  ;;  %v1807_v46 = vadd.f32 %v1806_v0, %v1805_v44 }
 0x39f   : > { %v1477_v61 = vadd.f32 %v1476_v16, %v1380_v4  ;;  %v1383_v38 = vadd.f32 %v1807_v46, %v3357_v26 }
 0x3a0   : > { %v1884_v60 = vpop.f32.mrb[12].mxu1 }
 0x3a1   : > { %1527 = vst [vmem:[%s3363_s15 + $0x20] sm:$0xff] %v1477_v61  ;;  %v1480_v34 = vadd.f32 %v1479_v57, %v1383_v38  ;;  %v1808_v17 = vpop.f32.mrb[12].mxu0  ;;  %v1508_v1 = vpop.f32.mrb[13].mxu1 }
 0x3a2   : > { %v1809_v7 = vpop.f32.mrb[13].mxu0  ;;  %v1885_v52 = vpop.f32.mrb[14].mxu1 }
 0x3a3   : > { %1528 = vst [vmem:[%s3363_s15 + $0x28] sm:$0xff] %v1480_v34  ;;  %v1810_v25 = vadd.f32 %v1809_v7, %v1808_v17  ;;  %v1811_v3 = vpop.f32.mrb[14].mxu0  ;;  %v1511_v49 = vpop.f32.mrb[15].mxu1 }
 0x3a4   : > { %v1812_v21 = vpop.f32.mrb[15].mxu0 }
 0x3a5   : > { %v1388_v20 = vadd.f32 %v1810_v25, %v3357_v26  ;;  %v1813_v18 = vadd.f32 %v1812_v21, %v1811_v3 }
 0x3a7   : > { %v1485_v29 = vadd.f32 %v1876_v35, %v1388_v20  ;;  %v1391_v41 = vadd.f32 %v1813_v18, %v3357_v26 }
 0x3a9   : > { %1529 = vst [vmem:[%s3363_s15 + $0x30] sm:$0xff] %v1485_v29  ;;  %v1488_v36 = vadd.f32 %v1877_v53, %v1391_v41  ;;  %v1814_v33 = vpop.f32.mrb[16].mxu0 }
 0x3aa   : > { %v1815_v10 = vpop.f32.mrb[17].mxu0 }
 0x3ab   : > { %1530 = vst [vmem:[%s3363_s15 + $0x38] sm:$0xff] %v1488_v36  ;;  %v1816_v22 = vadd.f32 %v1815_v10, %v1814_v33  ;;  %v1817_v15 = vpop.f32.mrb[18].mxu0 }
 0x3ac   : > { %v1818_v62 = vpop.f32.mrb[19].mxu0 }
 0x3ad   : > { %v1396_v32 = vadd.f32 %v1816_v22, %v3357_v26  ;;  %v1819_v50 = vadd.f32 %v1818_v62, %v1817_v15 }
 0x3af   : > { %v1493_v42 = vadd.f32 %v1492_v37, %v1396_v32  ;;  %v1399_v23 = vadd.f32 %v1819_v50, %v3357_v26 }
 0x3b1   : > { %1531 = vst [vmem:[%s3363_s15 + $0x40] sm:$0xff] %v1493_v42  ;;  %v1496_v51 = vadd.f32 %v1495_v19, %v1399_v23  ;;  %v1820_v30 = vpop.f32.mrb[20].mxu0 }
 0x3b2   : > { %v1821_v47 = vpop.f32.mrb[21].mxu0 }
 0x3b3   : > { %1532 = vst [vmem:[%s3363_s15 + $0x48] sm:$0xff] %v1496_v51  ;;  %v1822_v28 = vadd.f32 %v1821_v47, %v1820_v30  ;;  %v1823_v31 = vpop.f32.mrb[22].mxu0 }
 0x3b4   : > { %v1824_v43 = vpop.f32.mrb[23].mxu0 }
 0x3b5   : > { %v1404_v9 = vadd.f32 %v1822_v28, %v3357_v26  ;;  %v1825_v11 = vadd.f32 %v1824_v43, %v1823_v31 }
 0x3b7   : > { %v1501_v54 = vadd.f32 %v1880_v24, %v1404_v9  ;;  %v1407_v58 = vadd.f32 %v1825_v11, %v3357_v26 }
 0x3b9   : > { %1533 = vst [vmem:[%s3363_s15 + $0x50] sm:$0xff] %v1501_v54  ;;  %v1504_v39 = vadd.f32 %v1881_v6, %v1407_v58  ;;  %v1826_v27 = vpop.f32.mrb[24].mxu0 }
 0x3ba   : > { %v1827_v35 = vpop.f32.mrb[25].mxu0 }
 0x3bb   : > { %1534 = vst [vmem:[%s3363_s15 + $0x58] sm:$0xff] %v1504_v39  ;;  %v1828_v55 = vadd.f32 %v1827_v35, %v1826_v27  ;;  %v1829_v16 = vpop.f32.mrb[26].mxu0 }
 0x3bc   : > { %v1830_v45 = vpop.f32.mrb[27].mxu0 }
 0x3bd   : > { %v1412_v8 = vadd.f32 %v1828_v55, %v3357_v26  ;;  %v1831_v53 = vadd.f32 %v1830_v45, %v1829_v16 }
 0x3bf   : > { %v1509_v48 = vadd.f32 %v1508_v1, %v1412_v8  ;;  %v1415_v57 = vadd.f32 %v1831_v53, %v3357_v26 }
 0x3c1   : > { %1535 = vst [vmem:[%s3363_s15 + $0x60] sm:$0xff] %v1509_v48  ;;  %v1512_v12 = vadd.f32 %v1511_v49, %v1415_v57  ;;  %v1832_v59 = vpop.f32.mrb[28].mxu0 }
 0x3c2   : > { %v1833_v5 = vpop.f32.mrb[29].mxu0 }
 0x3c3   : > { %1536 = vst [vmem:[%s3363_s15 + $0x68] sm:$0xff] %v1512_v12  ;;  %v1834_v2 = vadd.f32 %v1833_v5, %v1832_v59  ;;  %v1835_v14 = vpop.f32.mrb[30].mxu0 }
 0x3c4   : > { %v1836_v13 = vpop.f32.mrb[31].mxu0 }
 0x3c5   : > { %v1420_v24 = vadd.f32 %v1834_v2, %v3357_v26  ;;  %v1837_v40 = vadd.f32 %v1836_v13, %v1835_v14 }
 0x3c7   : > { %v1517_v37 = vadd.f32 %v1884_v60, %v1420_v24  ;;  %v1423_v63 = vadd.f32 %v1837_v40, %v3357_v26 }
 0x3c9   : > { %1537 = vst [vmem:[%s3363_s15 + $0x70] sm:$0xff] %v1517_v37  ;;  %v1520_v56 = vadd.f32 %v1885_v52, %v1423_v63 }
 0x3cb   : > { %1538 = vst [vmem:[%s3363_s15 + $0x78] sm:$0xff] %v1520_v56 }
 0x3cc   : > { %2154 = shalt.err (!%p2151_p12)
}
 0x3cd   : > { %s2155_s25 = scalar_lea.hbm %s3398_s24, 2048  ;;  %s2159_s15 = scalar_lea.hbm %s3554_s20, 8192 }
 0x3ce   : > { %p2156_p1 = scmp.ne.s32.totalorder %s3398_s24, %s2155_s25  ;;  %p2160_p3 = scmp.lt.u32.totalorder %s3398_s24, %s3554_s20 }
 0x3cf   : > { %p2161_p13 = scmp.lt.u32.totalorder %s2159_s15, %s2155_s25  ;;  %p2163_p9 = scmp.lt.u32.totalorder %s2155_s25, %s3398_s24 }
 0x3d0   : > { %p2157_p6 = pnand %p2156_p1, %p3555_p11 }
 0x3d1   : > { %p2162_p7 = por %p2161_p13, %p2160_p3 }
 0x3d2   : > { %p2158_p10 = pneg %p2157_p6 }
 0x3d3   : > { %p2164_p0 = por %p2163_p9, %p2162_p7 }
 0x3d5   : > { %p2165_p2 = pnand %p2164_p0, %p2158_p10 }
 0x3d7   : > { %2168 = shalt.err (!%p2165_p2)
}
 0x3d8   : > { %s2247_s19 = smov 128   ;;  %s2248_s12 = smov 8  }
 0x3d9   : > { %1892 = dma.vmem_to_hbm [thread:$0]  (%p3555_p11), %s3400_s8, 2048, %s3398_s24, %s3406_s13, %s2247_s19, %s2247_s19, %s2248_s12  }
 0x3da PF: > { %s3556_s23 = sld [smem:[#allocation11_spill]]  ;;  %s3557_s14 = sld [smem:[#allocation12_spill]] }
 0x3db   : > { %p1909_p4 = scmp.ge.s32.totalorder %s2235_s11, 2 }
 0x3e0   : > { %s1568_s30 = sand.u32 1, %s3556_s23   ;;  %p3558_p5 = scmp.ne.s32.totalorder %s3557_s14, 0 }
 0x3e1   : > { %s1569_s25 = scalar_lea.sflag [#allocation4], %s1568_s30 }
 0x3e2   : > { %p1903_p8 = pnand %p1909_p4, %p3558_p5 }
 0x3e4   : > { %2206 = dma.done.wait (!%p1903_p8), %s1569_s25, 2048  }
 0x3e5   : > { %2208 = vsyncadd (!%p1903_p8), %s1569_s25, 4294965248  ;;  %s3559_s18 = smov %s2401_s27  ;;  %p22_p11 = scmp.ge.s32.totalorder %s2368_s22, 6  }
 0x3e6   : > { %s3560_s27 = smov %s2215_s28  ;;  %s3561_s28 = smov %s2219_s29 }
 0x3e7   : > { %s3562_s29 = smov %s2406_s21  ;;  %s3563_s30 = smov %s2227_s9 }
 0x3e8   : > { %s3564_s9 = smov %s2231_s10  ;;  %s3565_s10 = smov %s3559_s18 }
 0x3e9   : > { %s3566_s11 = smov %s2368_s22  ;;  %24 = sbr.rel (!%p22_p11) target bundleno = 11 (0xb), region = 107 }
 0x3f0   :  { %1574 = vsyncpa [#allocation3], 1 }
 0x3f1   :  { %1576 = vsyncpa [#allocation3 + $0x1], 1 }
 0x3f2   :  { %1577 = vsyncpa [#allocation6], 1 }
 0x3f3   :  { %1578 = vsyncpa [#allocation4], 1 }
 0x3f4   :  { %1580 = vsyncpa [#allocation4 + $0x1], 1 }

</bundles_post_ra>
